<compile_context>
chip_gen: v6e
topology: v6e:2x2x1
jax: 0.10.0
libtpu: 0.0.40
codegen_flags: <defaults>
</compile_context>

<pallas_src>
import functools

import jax
import jax.numpy as jnp
from jax.experimental import pallas as pl
from jax.experimental.pallas import tpu as pltpu

LANE = 128
SUB = 8


def _round_up(x, m):
    return ((x + m - 1) // m) * m


def _pad2(a, rows, cols, dtype):
    r, c = a.shape
    return jnp.pad(a, ((0, rows - r), (0, cols - c))).astype(dtype)


def _device_kind():
    try:
        return jax.devices()[0].device_kind.lower()
    except Exception:
        return ""


def mlp3_kernel(alpha_ref,                       # SMEM (4,) f32 PReLU slopes
                x_ref,                           # (tb, in_pad) bf16
                w1_ref, b1_ref, w2_ref, b2_ref,
                w3_ref, b3_ref, w4_ref, b4_ref,
                w5_ref, b5_ref,
                o_ref,                           # (tb, out_dim) f32
                *, epi_dtype, fold_b1, fold_b5, row_chunks):
    out_dim = o_ref.shape[-1]

    # PReLU slopes: splat to a (1,1) f32 vector, then cast to the epilogue dtype
    # (avoids bf16 scalar ops; the (1,1) operand stays a replicated vreg).
    def splat(v):
        return jnp.full((1, 1), v, dtype=jnp.float32).astype(epi_dtype)

    a = [splat(alpha_ref[i]) for i in range(4)]

    # Biases: read once, cast once to the epilogue dtype (hoisted out of the chunk loop).
    b1 = None if fold_b1 else b1_ref[...].astype(epi_dtype)
    b2 = b2_ref[...].astype(epi_dtype)
    b3 = b3_ref[...].astype(epi_dtype)
    b4 = b4_ref[...].astype(epi_dtype)
    b5 = None if fold_b5 else b5_ref[...]        # final-layer bias stays f32

    def dense(h, w_ref, b):
        acc = jnp.dot(h.astype(jnp.bfloat16), w_ref[...],
                      preferred_element_type=jnp.float32)
        acc = acc.astype(epi_dtype)
        return acc if b is None else acc + b

    def prelu(h, a_k):
        return jnp.where(h > 0, h, a_k * h)

    tb = x_ref.shape[0]
    rows = tb // row_chunks
    # Static unroll over independent row sub-chunks: lets the MXU of one chunk's layer
    # overlap the VPU epilogue (bias + PReLU) of the other chunk.
    for c in range(row_chunks):
        r0 = c * rows
        h = x_ref[pl.ds(r0, rows), :]
        h = prelu(dense(h, w1_ref, b1), a[0])
        h = prelu(dense(h, w2_ref, b2), a[1])
        h = prelu(dense(h, w3_ref, b3), a[2])
        h = prelu(dense(h, w4_ref, b4), a[3])
        # Final layer: keep the f32 accumulator for the logits.
        acc = jnp.dot(h.astype(jnp.bfloat16), w5_ref[...],
                      preferred_element_type=jnp.float32)
        if b5 is not None:
            acc = acc + b5
        o_ref[pl.ds(r0, rows), :] = acc[:, :out_dim].astype(o_ref.dtype)


def mlp3_no_dropout(x, params, *, tb=1024, row_chunks=2,
                    epilogue_dtype=None, two_core_hint=None):
    """x: (B, input_size) f32. params: dict of f32 w1..w5, b1..b5, alphas(4,)."""
    B, in_dim = x.shape
    dims = [in_dim] + [params[f"w{i}"].shape[1] for i in range(1, 6)]
    out_dim = dims[-1]
    # Lane-dense padded feature dims for the internal activations/weights.
    pdims = [_round_up(d, LANE) for d in dims]
    in_pad = pdims[0]

    kind = _device_kind()
    if epilogue_dtype is None:
        # v5-class chips have no bf16 VPU -> keep the epilogue in f32 there.
        epilogue_dtype = jnp.float32 if "v5" in kind else jnp.bfloat16
    if two_core_hint is None:
        two_core_hint = "v7" in kind             # only v7x has 2 TensorCores

    # ---- batch tiling -------------------------------------------------------
    tb = max(SUB, (int(tb) // SUB) * SUB)
    b8 = _round_up(B, SUB)
    tb_eff = min(tb, b8)
    # Split into >=2 grid steps only when a second TensorCore exists to use them.
    if two_core_hint and b8 // tb_eff < 2 and tb_eff >= 2 * SUB:
        tb_eff = _round_up(tb_eff // 2, SUB)
    B_pad = _round_up(b8, tb_eff)
    grid = (B_pad // tb_eff,)

    rc = max(1, int(row_chunks))
    while rc > 1 and (tb_eff % rc != 0 or (tb_eff // rc) % SUB != 0):
        rc -= 1

    # ---- bias folding opportunities ----------------------------------------
    fold_b1 = in_dim < in_pad                    # spare padded input column available
    fold_b5 = dims[4] < pdims[4]                 # spare padded layer-4 column available

    # ---- pad + cast operands (pad fused with the bf16 cast) -----------------
    x_p = jnp.zeros((B_pad, in_pad), jnp.bfloat16)
    x_p = x_p.at[:B, :in_dim].set(x.astype(jnp.bfloat16))
    if fold_b1:
        x_p = x_p.at[:, in_dim].set(1.0)         # ones column feeding the folded bias

    w_p, b_p = [], []
    for li in range(5):
        w_p.append(_pad2(params[f"w{li + 1}"], pdims[li], pdims[li + 1], jnp.bfloat16))
        b_p.append(_pad2(params[f"b{li + 1}"], 1, pdims[li + 1], jnp.float32))
    if fold_b1:
        # b1 goes into the padded input row of W1; the ones column in x multiplies it.
        w_p[0] = w_p[0].at[in_dim, :].set(b_p[0][0].astype(jnp.bfloat16))
    if fold_b5:
        # Plant a 1.0 in the padded lane of the layer-4 bias (survives PReLU), and put
        # b5 in the matching padded row of W5 so the final dot adds it for free.
        b_p[3] = b_p[3].at[0, dims[4]].set(1.0)
        w_p[4] = w_p[4].at[dims[4], :].set(b_p[4][0].astype(jnp.bfloat16))

    # ---- specs / cost --------------------------------------------------------
    flops = 2 * B_pad * sum(pdims[i] * pdims[i + 1] for i in range(5))
    bytes_accessed = (int(x_p.size) * 2
                      + sum(int(w.size) * 2 for w in w_p)
                      + sum(int(b.size) * 4 for b in b_p)
                      + B_pad * out_dim * 4 + 16)

    def resident(arr):
        # Whole weight/bias resident in VMEM across the batch grid.
        return pl.BlockSpec(arr.shape, lambda i: (0, 0))

    in_specs = [pl.BlockSpec(memory_space=pltpu.MemorySpace.SMEM),       # alphas (4,)
                pl.BlockSpec((tb_eff, in_pad), lambda i: (i, 0))]        # x tile (bf16)
    for w, b in zip(w_p, b_p):
        in_specs.append(resident(w))
        in_specs.append(resident(b))

    kernel = functools.partial(mlp3_kernel, epi_dtype=epilogue_dtype,
                               fold_b1=fold_b1, fold_b5=fold_b5, row_chunks=rc)

    out = pl.pallas_call(
        kernel,
        out_shape=jax.ShapeDtypeStruct((B_pad, out_dim), jnp.float32),
        grid=grid,
        in_specs=in_specs,
        out_specs=pl.BlockSpec((tb_eff, out_dim), lambda i: (i, 0)),
        compiler_params=pltpu.CompilerParams(
            dimension_semantics=("parallel",)),
        cost_estimate=pl.CostEstimate(flops=flops, transcendentals=0,
                                      bytes_accessed=bytes_accessed),
    )(params["alphas"].astype(jnp.float32), x_p,
      *[t for pair in zip(w_p, b_p) for t in pair])

    return out[:B] if B_pad != B else out


def init_params(key, input_size, output_size):
    dims = [input_size, 512, 256, 128, 64, output_size]
    params = {}
    keys = jax.random.split(key, 2 * (len(dims) - 1))
    for li in range(len(dims) - 1):
        fan_in, fan_out = dims[li], dims[li + 1]
        bound = 1.0 / jnp.sqrt(fan_in)
        params[f"w{li + 1}"] = jax.random.uniform(
            keys[2 * li], (fan_in, fan_out), minval=-bound, maxval=bound,
            dtype=jnp.float32)
        params[f"b{li + 1}"] = jax.random.uniform(
            keys[2 * li + 1], (1, fan_out), minval=-bound, maxval=bound,
            dtype=jnp.float32)
    # torch.nn.PReLU() default: single shared scalar slope, init 0.25, one per activation.
    params["alphas"] = jnp.full((4,), 0.25, dtype=jnp.float32)
    return params


def reference_forward(x, params):
    h = x
    for li in range(1, 6):
        h = h @ params[f"w{li}"] + params[f"b{li}"]
        if li < 5:
            a = params["alphas"][li - 1]
            h = jnp.where(h > 0, h, a * h)
    return h


if __name__ == "__main__":
    key = jax.random.PRNGKey(0)
    k_param, k_x = jax.random.split(key)

    input_size, output_size, batch = 4, 2, 32    # cartpole-ish: 4 obs dims -> 2 actions
    params = init_params(k_param, input_size, output_size)
    x = jax.random.normal(k_x, (batch, input_size), dtype=jnp.float32)

    out = jax.block_until_ready(mlp3_no_dropout(x, params))

    ref = reference_forward(x, params)
    assert out.shape == (batch, output_size)
    # bf16 weights/activations/epilogue inside the kernel -> loose tolerance vs f32 ref.
    max_err = float(jnp.max(jnp.abs(out - ref)))
    assert jnp.allclose(out, ref, atol=4e-2, rtol=4e-2), max_err

    print("KERNEL_OK")
</pallas_src>

<mosaic_0001>
module attributes {stable_mosaic.version = 11 : i64} {
  func.func @mlp3_kernel(%arg0: i32, %arg1: memref<4xf32, #tpu.memory_space<smem>>, %arg2: memref<32x128xbf16, #tpu.memory_space<vmem>>, %arg3: memref<128x512xbf16, #tpu.memory_space<vmem>>, %arg4: memref<1x512xf32, #tpu.memory_space<vmem>>, %arg5: memref<512x256xbf16, #tpu.memory_space<vmem>>, %arg6: memref<1x256xf32, #tpu.memory_space<vmem>>, %arg7: memref<256x128xbf16, #tpu.memory_space<vmem>>, %arg8: memref<1x128xf32, #tpu.memory_space<vmem>>, %arg9: memref<128x128xbf16, #tpu.memory_space<vmem>>, %arg10: memref<1x128xf32, #tpu.memory_space<vmem>>, %arg11: memref<128x128xbf16, #tpu.memory_space<vmem>>, %arg12: memref<1x128xf32, #tpu.memory_space<vmem>>, %arg13: memref<32x2xf32, #tpu.memory_space<vmem>>) attributes {dimension_semantics = [#tpu.dimension_semantics<parallel>], iteration_bounds = array<i64: 1>, scalar_prefetch = 0 : i64, scratch_operands = 0 : i64, tpu.core_type = #tpu.core_type<tc>, window_params = [{transform_indices = @transform_0, window_bounds = array<i64: 4>}, {transform_indices = @transform_1, window_bounds = array<i64: 32, 128>}, {pipeline_mode = #tpu.pipeline_mode<synchronous>, transform_indices = @transform_2, window_bounds = array<i64: 128, 512>}, {pipeline_mode = #tpu.pipeline_mode<synchronous>, transform_indices = @transform_3, window_bounds = array<i64: 1, 512>}, {pipeline_mode = #tpu.pipeline_mode<synchronous>, transform_indices = @transform_4, window_bounds = array<i64: 512, 256>}, {pipeline_mode = #tpu.pipeline_mode<synchronous>, transform_indices = @transform_5, window_bounds = array<i64: 1, 256>}, {pipeline_mode = #tpu.pipeline_mode<synchronous>, transform_indices = @transform_6, window_bounds = array<i64: 256, 128>}, {pipeline_mode = #tpu.pipeline_mode<synchronous>, transform_indices = @transform_7, window_bounds = array<i64: 1, 128>}, {pipeline_mode = #tpu.pipeline_mode<synchronous>, transform_indices = @transform_8, window_bounds = array<i64: 128, 128>}, {pipeline_mode = #tpu.pipeline_mode<synchronous>, transform_indices = @transform_9, window_bounds = array<i64: 1, 128>}, {pipeline_mode = #tpu.pipeline_mode<synchronous>, transform_indices = @transform_10, window_bounds = array<i64: 128, 128>}, {pipeline_mode = #tpu.pipeline_mode<synchronous>, transform_indices = @transform_11, window_bounds = array<i64: 1, 128>}, {transform_indices = @transform_12, window_bounds = array<i64: 32, 2>}]} {
    %c0 = arith.constant 0 : index
    %0 = memref.load %arg1[%c0] : memref<4xf32, #tpu.memory_space<smem>>
    %1 = vector.broadcast %0 : f32 to vector<1x1xf32>
    %2 = arith.truncf %1 : vector<1x1xf32> to vector<1x1xbf16>
    %c1 = arith.constant 1 : index
    %3 = memref.load %arg1[%c1] : memref<4xf32, #tpu.memory_space<smem>>
    %4 = vector.broadcast %3 : f32 to vector<1x1xf32>
    %5 = arith.truncf %4 : vector<1x1xf32> to vector<1x1xbf16>
    %c2 = arith.constant 2 : index
    %6 = memref.load %arg1[%c2] : memref<4xf32, #tpu.memory_space<smem>>
    %7 = vector.broadcast %6 : f32 to vector<1x1xf32>
    %8 = arith.truncf %7 : vector<1x1xf32> to vector<1x1xbf16>
    %c3 = arith.constant 3 : index
    %9 = memref.load %arg1[%c3] : memref<4xf32, #tpu.memory_space<smem>>
    %10 = vector.broadcast %9 : f32 to vector<1x1xf32>
    %11 = arith.truncf %10 : vector<1x1xf32> to vector<1x1xbf16>
    %c0_0 = arith.constant 0 : index
    %c0_1 = arith.constant 0 : index
    %12 = vector.load %arg6[%c0_0, %c0_1] : memref<1x256xf32, #tpu.memory_space<vmem>>, vector<1x256xf32>
    %13 = arith.truncf %12 : vector<1x256xf32> to vector<1x256xbf16>
    %c0_2 = arith.constant 0 : index
    %c0_3 = arith.constant 0 : index
    %14 = vector.load %arg8[%c0_2, %c0_3] : memref<1x128xf32, #tpu.memory_space<vmem>>, vector<1x128xf32>
    %15 = arith.truncf %14 : vector<1x128xf32> to vector<1x128xbf16>
    %c0_4 = arith.constant 0 : index
    %c0_5 = arith.constant 0 : index
    %16 = vector.load %arg10[%c0_4, %c0_5] : memref<1x128xf32, #tpu.memory_space<vmem>>, vector<1x128xf32>
    %17 = arith.truncf %16 : vector<1x128xf32> to vector<1x128xbf16>
    %c0_6 = arith.constant 0 : index
    %c0_7 = arith.constant 0 : index
    %18 = vector.load %arg2[%c0_6, %c0_7] : memref<32x128xbf16, #tpu.memory_space<vmem>>, vector<16x128xbf16>
    %c0_8 = arith.constant 0 : index
    %c0_9 = arith.constant 0 : index
    %19 = vector.load %arg3[%c0_8, %c0_9] : memref<128x512xbf16, #tpu.memory_space<vmem>>, vector<128x512xbf16>
    %cst = arith.constant dense<0.000000e+00> : vector<16x512xf32>
    %20 = tpu.matmul %18, %19, %cst {dimension_numbers = #tpu.dot_dimension_numbers<[1], [0], [0], [1], [0, 0, 1, 1], [], []>} : vector<16x128xbf16>, vector<128x512xbf16>, vector<16x512xf32> -> vector<16x512xf32>
    %21 = arith.truncf %20 : vector<16x512xf32> to vector<16x512xbf16>
    %cst_10 = arith.constant 0.000000e+00 : bf16
    %22 = vector.broadcast %cst_10 : bf16 to vector<16x512xbf16>
    %23 = arith.cmpf ogt, %21, %22 : vector<16x512xbf16>
    %24 = vector.broadcast %2 : vector<1x1xbf16> to vector<16x512xbf16>
    %25 = arith.mulf %24, %21 : vector<16x512xbf16>
    %26 = arith.select %23, %21, %25 : vector<16x512xi1>, vector<16x512xbf16>
    %c0_11 = arith.constant 0 : index
    %c0_12 = arith.constant 0 : index
    %27 = vector.load %arg5[%c0_11, %c0_12] : memref<512x256xbf16, #tpu.memory_space<vmem>>, vector<512x256xbf16>
    %cst_13 = arith.constant dense<0.000000e+00> : vector<16x256xf32>
    %28 = tpu.matmul %26, %27, %cst_13 {dimension_numbers = #tpu.dot_dimension_numbers<[1], [0], [0], [1], [0, 0, 1, 1], [], []>} : vector<16x512xbf16>, vector<512x256xbf16>, vector<16x256xf32> -> vector<16x256xf32>
    %29 = arith.truncf %28 : vector<16x256xf32> to vector<16x256xbf16>
    %30 = vector.broadcast %13 : vector<1x256xbf16> to vector<16x256xbf16>
    %31 = arith.addf %29, %30 : vector<16x256xbf16>
    %cst_14 = arith.constant 0.000000e+00 : bf16
    %32 = vector.broadcast %cst_14 : bf16 to vector<16x256xbf16>
    %33 = arith.cmpf ogt, %31, %32 : vector<16x256xbf16>
    %34 = vector.broadcast %5 : vector<1x1xbf16> to vector<16x256xbf16>
    %35 = arith.mulf %34, %31 : vector<16x256xbf16>
    %36 = arith.select %33, %31, %35 : vector<16x256xi1>, vector<16x256xbf16>
    %c0_15 = arith.constant 0 : index
    %c0_16 = arith.constant 0 : index
    %37 = vector.load %arg7[%c0_15, %c0_16] : memref<256x128xbf16, #tpu.memory_space<vmem>>, vector<256x128xbf16>
    %cst_17 = arith.constant dense<0.000000e+00> : vector<16x128xf32>
    %38 = tpu.matmul %36, %37, %cst_17 {dimension_numbers = #tpu.dot_dimension_numbers<[1], [0], [0], [1], [0, 0, 1, 1], [], []>} : vector<16x256xbf16>, vector<256x128xbf16>, vector<16x128xf32> -> vector<16x128xf32>
    %39 = arith.truncf %38 : vector<16x128xf32> to vector<16x128xbf16>
    %40 = vector.broadcast %15 : vector<1x128xbf16> to vector<16x128xbf16>
    %41 = arith.addf %39, %40 : vector<16x128xbf16>
    %cst_18 = arith.constant 0.000000e+00 : bf16
    %42 = vector.broadcast %cst_18 : bf16 to vector<16x128xbf16>
    %43 = arith.cmpf ogt, %41, %42 : vector<16x128xbf16>
    %44 = vector.broadcast %8 : vector<1x1xbf16> to vector<16x128xbf16>
    %45 = arith.mulf %44, %41 : vector<16x128xbf16>
    %46 = arith.select %43, %41, %45 : vector<16x128xi1>, vector<16x128xbf16>
    %c0_19 = arith.constant 0 : index
    %c0_20 = arith.constant 0 : index
    %47 = vector.load %arg9[%c0_19, %c0_20] : memref<128x128xbf16, #tpu.memory_space<vmem>>, vector<128x128xbf16>
    %cst_21 = arith.constant dense<0.000000e+00> : vector<16x128xf32>
    %48 = tpu.matmul %46, %47, %cst_21 {dimension_numbers = #tpu.dot_dimension_numbers<[1], [0], [0], [1], [0, 0, 1, 1], [], []>} : vector<16x128xbf16>, vector<128x128xbf16>, vector<16x128xf32> -> vector<16x128xf32>
    %49 = arith.truncf %48 : vector<16x128xf32> to vector<16x128xbf16>
    %50 = vector.broadcast %17 : vector<1x128xbf16> to vector<16x128xbf16>
    %51 = arith.addf %49, %50 : vector<16x128xbf16>
    %cst_22 = arith.constant 0.000000e+00 : bf16
    %52 = vector.broadcast %cst_22 : bf16 to vector<16x128xbf16>
    %53 = arith.cmpf ogt, %51, %52 : vector<16x128xbf16>
    %54 = vector.broadcast %11 : vector<1x1xbf16> to vector<16x128xbf16>
    %55 = arith.mulf %54, %51 : vector<16x128xbf16>
    %56 = arith.select %53, %51, %55 : vector<16x128xi1>, vector<16x128xbf16>
    %c0_23 = arith.constant 0 : index
    %c0_24 = arith.constant 0 : index
    %57 = vector.load %arg11[%c0_23, %c0_24] : memref<128x128xbf16, #tpu.memory_space<vmem>>, vector<128x128xbf16>
    %cst_25 = arith.constant dense<0.000000e+00> : vector<16x128xf32>
    %58 = tpu.matmul %56, %57, %cst_25 {dimension_numbers = #tpu.dot_dimension_numbers<[1], [0], [0], [1], [0, 0, 1, 1], [], []>} : vector<16x128xbf16>, vector<128x128xbf16>, vector<16x128xf32> -> vector<16x128xf32>
    %59 = vector.extract_strided_slice %58 {offsets = [0, 0], sizes = [16, 2], strides = [1, 1]} : vector<16x128xf32> to vector<16x2xf32>
    %c0_26 = arith.constant 0 : index
    %c0_27 = arith.constant 0 : index
    %60 = vector.load %arg13[%c0_26, %c0_27] : memref<32x2xf32, #tpu.memory_space<vmem>>, vector<16x2xf32>
    tpu.vector_store %arg13[%c0_26, %c0_27], %59 {strides = array<i32>} : memref<32x2xf32, #tpu.memory_space<vmem>>, vector<16x2xf32>,
    %c16 = arith.constant 16 : index
    %c0_28 = arith.constant 0 : index
    %61 = vector.load %arg2[%c16, %c0_28] : memref<32x128xbf16, #tpu.memory_space<vmem>>, vector<16x128xbf16>
    %c0_29 = arith.constant 0 : index
    %c0_30 = arith.constant 0 : index
    %62 = vector.load %arg3[%c0_29, %c0_30] : memref<128x512xbf16, #tpu.memory_space<vmem>>, vector<128x512xbf16>
    %cst_31 = arith.constant dense<0.000000e+00> : vector<16x512xf32>
    %63 = tpu.matmul %61, %62, %cst_31 {dimension_numbers = #tpu.dot_dimension_numbers<[1], [0], [0], [1], [0, 0, 1, 1], [], []>} : vector<16x128xbf16>, vector<128x512xbf16>, vector<16x512xf32> -> vector<16x512xf32>
    %64 = arith.truncf %63 : vector<16x512xf32> to vector<16x512xbf16>
    %cst_32 = arith.constant 0.000000e+00 : bf16
    %65 = vector.broadcast %cst_32 : bf16 to vector<16x512xbf16>
    %66 = arith.cmpf ogt, %64, %65 : vector<16x512xbf16>
    %67 = vector.broadcast %2 : vector<1x1xbf16> to vector<16x512xbf16>
    %68 = arith.mulf %67, %64 : vector<16x512xbf16>
    %69 = arith.select %66, %64, %68 : vector<16x512xi1>, vector<16x512xbf16>
    %c0_33 = arith.constant 0 : index
    %c0_34 = arith.constant 0 : index
    %70 = vector.load %arg5[%c0_33, %c0_34] : memref<512x256xbf16, #tpu.memory_space<vmem>>, vector<512x256xbf16>
    %cst_35 = arith.constant dense<0.000000e+00> : vector<16x256xf32>
    %71 = tpu.matmul %69, %70, %cst_35 {dimension_numbers = #tpu.dot_dimension_numbers<[1], [0], [0], [1], [0, 0, 1, 1], [], []>} : vector<16x512xbf16>, vector<512x256xbf16>, vector<16x256xf32> -> vector<16x256xf32>
    %72 = arith.truncf %71 : vector<16x256xf32> to vector<16x256xbf16>
    %73 = vector.broadcast %13 : vector<1x256xbf16> to vector<16x256xbf16>
    %74 = arith.addf %72, %73 : vector<16x256xbf16>
    %cst_36 = arith.constant 0.000000e+00 : bf16
    %75 = vector.broadcast %cst_36 : bf16 to vector<16x256xbf16>
    %76 = arith.cmpf ogt, %74, %75 : vector<16x256xbf16>
    %77 = vector.broadcast %5 : vector<1x1xbf16> to vector<16x256xbf16>
    %78 = arith.mulf %77, %74 : vector<16x256xbf16>
    %79 = arith.select %76, %74, %78 : vector<16x256xi1>, vector<16x256xbf16>
    %c0_37 = arith.constant 0 : index
    %c0_38 = arith.constant 0 : index
    %80 = vector.load %arg7[%c0_37, %c0_38] : memref<256x128xbf16, #tpu.memory_space<vmem>>, vector<256x128xbf16>
    %cst_39 = arith.constant dense<0.000000e+00> : vector<16x128xf32>
    %81 = tpu.matmul %79, %80, %cst_39 {dimension_numbers = #tpu.dot_dimension_numbers<[1], [0], [0], [1], [0, 0, 1, 1], [], []>} : vector<16x256xbf16>, vector<256x128xbf16>, vector<16x128xf32> -> vector<16x128xf32>
    %82 = arith.truncf %81 : vector<16x128xf32> to vector<16x128xbf16>
    %83 = vector.broadcast %15 : vector<1x128xbf16> to vector<16x128xbf16>
    %84 = arith.addf %82, %83 : vector<16x128xbf16>
    %cst_40 = arith.constant 0.000000e+00 : bf16
    %85 = vector.broadcast %cst_40 : bf16 to vector<16x128xbf16>
    %86 = arith.cmpf ogt, %84, %85 : vector<16x128xbf16>
    %87 = vector.broadcast %8 : vector<1x1xbf16> to vector<16x128xbf16>
    %88 = arith.mulf %87, %84 : vector<16x128xbf16>
    %89 = arith.select %86, %84, %88 : vector<16x128xi1>, vector<16x128xbf16>
    %c0_41 = arith.constant 0 : index
    %c0_42 = arith.constant 0 : index
    %90 = vector.load %arg9[%c0_41, %c0_42] : memref<128x128xbf16, #tpu.memory_space<vmem>>, vector<128x128xbf16>
    %cst_43 = arith.constant dense<0.000000e+00> : vector<16x128xf32>
    %91 = tpu.matmul %89, %90, %cst_43 {dimension_numbers = #tpu.dot_dimension_numbers<[1], [0], [0], [1], [0, 0, 1, 1], [], []>} : vector<16x128xbf16>, vector<128x128xbf16>, vector<16x128xf32> -> vector<16x128xf32>
    %92 = arith.truncf %91 : vector<16x128xf32> to vector<16x128xbf16>
    %93 = vector.broadcast %17 : vector<1x128xbf16> to vector<16x128xbf16>
    %94 = arith.addf %92, %93 : vector<16x128xbf16>
    %cst_44 = arith.constant 0.000000e+00 : bf16
    %95 = vector.broadcast %cst_44 : bf16 to vector<16x128xbf16>
    %96 = arith.cmpf ogt, %94, %95 : vector<16x128xbf16>
    %97 = vector.broadcast %11 : vector<1x1xbf16> to vector<16x128xbf16>
    %98 = arith.mulf %97, %94 : vector<16x128xbf16>
    %99 = arith.select %96, %94, %98 : vector<16x128xi1>, vector<16x128xbf16>
    %c0_45 = arith.constant 0 : index
    %c0_46 = arith.constant 0 : index
    %100 = vector.load %arg11[%c0_45, %c0_46] : memref<128x128xbf16, #tpu.memory_space<vmem>>, vector<128x128xbf16>
    %cst_47 = arith.constant dense<0.000000e+00> : vector<16x128xf32>
    %101 = tpu.matmul %99, %100, %cst_47 {dimension_numbers = #tpu.dot_dimension_numbers<[1], [0], [0], [1], [0, 0, 1, 1], [], []>} : vector<16x128xbf16>, vector<128x128xbf16>, vector<16x128xf32> -> vector<16x128xf32>
    %102 = vector.extract_strided_slice %101 {offsets = [0, 0], sizes = [16, 2], strides = [1, 1]} : vector<16x128xf32> to vector<16x2xf32>
    %c16_48 = arith.constant 16 : index
    %c0_49 = arith.constant 0 : index
    %103 = vector.load %arg13[%c16_48, %c0_49] : memref<32x2xf32, #tpu.memory_space<vmem>>, vector<16x2xf32>
    tpu.vector_store %arg13[%c16_48, %c0_49], %102 {strides = array<i32>} : memref<32x2xf32, #tpu.memory_space<vmem>>, vector<16x2xf32>,
    return
  }
  func.func @transform_0(%arg0: i32) -> i32 {
    %c0_i32 = arith.constant 0 : i32
    %c0_i32_0 = arith.constant 0 : i32
    return %c0_i32 : i32
  }
  func.func @transform_1(%arg0: i32) -> (i32, i32) {
    %c0_i32 = arith.constant 0 : i32
    %c0_i32_0 = arith.constant 0 : i32
    return %arg0, %c0_i32 : i32, i32
  }
  func.func @transform_2(%arg0: i32) -> (i32, i32) {
    %c0_i32 = arith.constant 0 : i32
    %c0_i32_0 = arith.constant 0 : i32
    %c0_i32_1 = arith.constant 0 : i32
    return %c0_i32, %c0_i32_0 : i32, i32
  }
  func.func @transform_3(%arg0: i32) -> (i32, i32) {
    %c0_i32 = arith.constant 0 : i32
    %c0_i32_0 = arith.constant 0 : i32
    %c0_i32_1 = arith.constant 0 : i32
    return %c0_i32, %c0_i32_0 : i32, i32
  }
  func.func @transform_4(%arg0: i32) -> (i32, i32) {
    %c0_i32 = arith.constant 0 : i32
    %c0_i32_0 = arith.constant 0 : i32
    %c0_i32_1 = arith.constant 0 : i32
    return %c0_i32, %c0_i32_0 : i32, i32
  }
  func.func @transform_5(%arg0: i32) -> (i32, i32) {
    %c0_i32 = arith.constant 0 : i32
    %c0_i32_0 = arith.constant 0 : i32
    %c0_i32_1 = arith.constant 0 : i32
    return %c0_i32, %c0_i32_0 : i32, i32
  }
  func.func @transform_6(%arg0: i32) -> (i32, i32) {
    %c0_i32 = arith.constant 0 : i32
    %c0_i32_0 = arith.constant 0 : i32
    %c0_i32_1 = arith.constant 0 : i32
    return %c0_i32, %c0_i32_0 : i32, i32
  }
  func.func @transform_7(%arg0: i32) -> (i32, i32) {
    %c0_i32 = arith.constant 0 : i32
    %c0_i32_0 = arith.constant 0 : i32
    %c0_i32_1 = arith.constant 0 : i32
    return %c0_i32, %c0_i32_0 : i32, i32
  }
  func.func @transform_8(%arg0: i32) -> (i32, i32) {
    %c0_i32 = arith.constant 0 : i32
    %c0_i32_0 = arith.constant 0 : i32
    %c0_i32_1 = arith.constant 0 : i32
    return %c0_i32, %c0_i32_0 : i32, i32
  }
  func.func @transform_9(%arg0: i32) -> (i32, i32) {
    %c0_i32 = arith.constant 0 : i32
    %c0_i32_0 = arith.constant 0 : i32
    %c0_i32_1 = arith.constant 0 : i32
    return %c0_i32, %c0_i32_0 : i32, i32
  }
  func.func @transform_10(%arg0: i32) -> (i32, i32) {
    %c0_i32 = arith.constant 0 : i32
    %c0_i32_0 = arith.constant 0 : i32
    %c0_i32_1 = arith.constant 0 : i32
    return %c0_i32, %c0_i32_0 : i32, i32
  }
  func.func @transform_11(%arg0: i32) -> (i32, i32) {
    %c0_i32 = arith.constant 0 : i32
    %c0_i32_0 = arith.constant 0 : i32
    %c0_i32_1 = arith.constant 0 : i32
    return %c0_i32, %c0_i32_0 : i32, i32
  }
  func.func @transform_12(%arg0: i32) -> (i32, i32) {
    %c0_i32 = arith.constant 0 : i32
    %c0_i32_0 = arith.constant 0 : i32
    return %arg0, %c0_i32 : i32, i32
  }
}

</mosaic_0001>

<bundles_post_ra>
// kernel: tpu_custom_call.1
= control target key start
LH: loop header
LB: loop body
LE: loop exit
PB: predicated region body
PF: predicated region fallthrough
CT: control target
= control target key end

     0   :  { %17 = vsyncpa [#allocation4], 0  ;;  %s3712_s0 = inlined_call_operand.hbm [shape: f32[4], index: 0, kind: input, shape index: {}]   ;;  %s3713_s1 = inlined_call_operand.hbm [shape: bf16[32,128], index: 1, kind: input, shape index: {}]   ;;  %s3714_s2 = inlined_call_operand.hbm [shape: bf16[128,512], index: 2, kind: input, shape index: {}]   ;;  %s3715_s3 = inlined_call_operand.vmem [shape: f32[1,512], index: 3, kind: input, shape index: {}]   ;;  %s3716_s4 = inlined_call_operand.hbm [shape: bf16[512,256], index: 4, kind: input, shape index: {}]   ;;  %s3717_s5 = inlined_call_operand.vmem [shape: f32[1,256], index: 5, kind: input, shape index: {}]   ;;  %s3718_s6 = inlined_call_operand.hbm [shape: bf16[256,128], index: 6, kind: input, shape index: {}]   ;;  %s3719_s7 = inlined_call_operand.vmem [shape: f32[1,128], index: 7, kind: input, shape index: {}]   ;;  %s3720_s8 = inlined_call_operand.hbm [shape: bf16[128,128], index: 8, kind: input, shape index: {}]   ;;  %s3721_s9 = inlined_call_operand.vmem [shape: f32[1,128], index: 9, kind: input, shape index: {}]   ;;  %s3722_s10 = inlined_call_operand.hbm [shape: bf16[128,128], index: 10, kind: input, shape index: {}]   ;;  %s3723_s11 = inlined_call_operand.vmem [shape: f32[1,128], index: 11, kind: input, shape index: {}]   ;;  %s3724_s12 = inlined_call_operand.vmem [shape: f32[32,2], index: 12, kind: output, shape index: {}]  }
   0x1   :  { %18 = vsyncpa [#allocation3], 0 }
   0x2   :  { %19 = vsyncpa [#allocation7], 0 }
   0x3   :  { %20 = vsyncpa [#allocation10], 0 }
   0x4   :  { %21 = vsyncpa [#allocation13], 0  ;;  %s3478_s20 = smov [#allocation6]  }
   0x5   :  { %s47_s21 = sshll.u32 %s3478_s20, 4  ;;  %s48_s21 = int_to_ptr.vmem [resolvable:$true] %s47_s21 }
   0x6   :  { %s3348_s22 = scalar_lea.vmem %s48_s21, 4096  ;;  %p3353_p1 = scmp.lt.s32.totalorder %s48_s21, %s48_s21 }
   0x7   :  { %p3349_p0 = scmp.ne.s32.totalorder %s48_s21, %s3348_s22  ;;  %p3354_p2 = scmp.lt.s32.totalorder %s3348_s22, %s3348_s22 }
   0x9   :  { %p3355_p3 = por %p3354_p2, %p3353_p1 }
   0xb   :  { %p3356_p4 = pnand %p3355_p3, %p3349_p0 }
   0xd   :  { %3359 = shalt.err (!%p3356_p4)
}
   0xe   :  { %s3479_s23 = smov 256   ;;  %s3480_s11 = smov 16  }
   0xf   :  { %53 = dma.hbm_to_vmem [thread:$0]  %s3714_s2, 4096, %s48_s21, [#allocation7], %s3479_s23, %s3479_s23, %s3480_s11  }
  0x10   :  { %s3481_s26 = smov [#allocation9]  }
  0x11   :  { %s75_s27 = sshll.u32 %s3481_s26, 4  ;;  %s76_s27 = int_to_ptr.vmem [resolvable:$true] %s75_s27 }
  0x12   :  { %s3368_s28 = scalar_lea.vmem %s76_s27, 2048  ;;  %p3373_p6 = scmp.lt.s32.totalorder %s76_s27, %s76_s27 }
  0x13   :  { %p3369_p5 = scmp.ne.s32.totalorder %s76_s27, %s3368_s28  ;;  %p3374_p7 = scmp.lt.s32.totalorder %s3368_s28, %s3368_s28 }
  0x15   :  { %p3375_p8 = por %p3374_p7, %p3373_p6 }
  0x17   :  { %p3376_p9 = pnand %p3375_p8, %p3369_p5 }
  0x19   :  { %3379 = shalt.err (!%p3376_p9)
}
  0x1a   :  { %s3482_s29 = smov 64   ;;  %s3483_s30 = smov 4  }
  0x1b   :  { %81 = dma.hbm_to_vmem [thread:$0]  %s3718_s6, 2048, %s76_s27, [#allocation10], %s3482_s29, %s3482_s29, %s3483_s30  }
  0x1c   :  { %s3484_s2 = smov [#allocation2]   ;;  %s3485_s16 = smov [#allocation5]  }
  0x1d   :  { %29 = dma.hbm_to_smem %s3712_s0, 16, %s3484_s2, [#allocation4]  }
  0x1e   :  { %s35_s17 = sshll.u32 %s3485_s16, 4  ;;  %s3486_s18 = smov [#allocation8]   ;;  %s36_s17 = int_to_ptr.vmem [resolvable:$true] %s35_s17 }
  0x1f   :  { %s61_s19 = sshll.u32 %s3486_s18, 4  ;;  %s3396_s20 = scalar_lea.vmem %s36_s17, 256  ;;  %s62_s19 = int_to_ptr.vmem [resolvable:$true] %s61_s19 }
  0x20   :  { %p3397_p10 = scmp.ne.s32.totalorder %s36_s17, %s3396_s20  ;;  %p3401_p11 = scmp.lt.s32.totalorder %s36_s17, %s36_s17 }
  0x21   :  { %p3402_p12 = scmp.lt.s32.totalorder %s3396_s20, %s3396_s20 }
  0x23   :  { %p3403_p13 = por %p3402_p12, %p3401_p11 }
  0x25   :  { %p3404_p0 = pnand %p3403_p13, %p3397_p10 }
  0x27   :  { %3407 = shalt.err (!%p3404_p0)
}
  0x28   :  { %41 = dma.hbm_to_vmem [thread:$0]  %s3713_s1, 256, %s36_s17, [#allocation3], %s3482_s29, %s3482_s29, %s3483_s30  }
  0x29   :  { %s3416_s0 = scalar_lea.vmem %s62_s19, 8192  ;;  %p3421_p2 = scmp.lt.s32.totalorder %s62_s19, %s62_s19 }
  0x2a   :  { %p3417_p1 = scmp.ne.s32.totalorder %s62_s19, %s3416_s0  ;;  %p3422_p3 = scmp.lt.s32.totalorder %s3416_s0, %s3416_s0 }
  0x2c   :  { %p3423_p4 = por %p3422_p3, %p3421_p2 }
  0x2e   :  { %p3424_p5 = pnand %p3423_p4, %p3417_p1 }
  0x30   :  { %3427 = shalt.err (!%p3424_p5)
}
  0x31   :  { %s3487_s22 = smov 128   ;;  %s3488_s23 = smov 8  }
  0x32   :  { %67 = dma.hbm_to_vmem [thread:$0]  %s3716_s4, 8192, %s62_s19, [#allocation7], %s3487_s22, %s3487_s22, %s3488_s23  }
  0x33   :  { %s3489_s25 = smov [#allocation11]   ;;  %s3490_s27 = smov [#allocation12]  }
  0x34   :  { %s89_s26 = sshll.u32 %s3489_s25, 4  ;;  %s103_s28 = sshll.u32 %s3490_s27, 4  ;;  %s90_s26 = int_to_ptr.vmem [resolvable:$true] %s89_s26  ;;  %s104_s28 = int_to_ptr.vmem [resolvable:$true] %s103_s28 }
  0x35   :  { %s3436_s1 = scalar_lea.vmem %s90_s26, 1024  ;;  %p3441_p7 = scmp.lt.s32.totalorder %s90_s26, %s90_s26 }
  0x36   :  { %p3437_p6 = scmp.ne.s32.totalorder %s90_s26, %s3436_s1  ;;  %p3442_p8 = scmp.lt.s32.totalorder %s3436_s1, %s3436_s1 }
  0x38   :  { %p3443_p9 = por %p3442_p8, %p3441_p7 }
  0x3a   :  { %p3444_p10 = pnand %p3443_p9, %p3437_p6 }
  0x3c   :  { %3447 = shalt.err (!%p3444_p10)
}
  0x3d   :  { %95 = dma.hbm_to_vmem [thread:$0]  %s3720_s8, 1024, %s90_s26, [#allocation10], %s3482_s29, %s3482_s29, %s3483_s30  }
  0x3e   :  { %s3456_s4 = scalar_lea.vmem %s104_s28, 1024  ;;  %p3461_p12 = scmp.lt.s32.totalorder %s104_s28, %s104_s28 }
  0x3f   :  { %p3457_p11 = scmp.ne.s32.totalorder %s104_s28, %s3456_s4  ;;  %p3462_p13 = scmp.lt.s32.totalorder %s3456_s4, %s3456_s4 }
  0x41   :  { %p3463_p0 = por %p3462_p13, %p3461_p12 }
  0x43   :  { %p3464_p1 = pnand %p3463_p0, %p3457_p11 }
  0x45   :  { %3467 = shalt.err (!%p3464_p1)
}
  0x46   :  { %109 = dma.hbm_to_vmem [thread:$0]  %s3722_s10, 1024, %s104_s28, [#allocation13], %s3482_s29, %s3482_s29, %s3483_s30  }
  0x47   :  { %3468 = dma.done.wait [#allocation4], 16  }
  0x48   :  { %3469 = vsyncadd [#allocation4], 4294967280 }
  0x49   :  { %3470 = dma.done.wait [#allocation3], 256  }
  0x4a   :  { %3471 = vsyncadd [#allocation3], 4294967040 }
  0x4b   :  { %3472 = dma.done.wait [#allocation7], 12288  }
  0x4c   :  { %3473 = vsyncadd [#allocation7], 4294955008 }
  0x4d   :  { %3474 = dma.done.wait [#allocation10], 3072  }
  0x4e   :  { %3475 = vsyncadd [#allocation10], 4294964224 }
  0x4f   :  { %3476 = dma.done.wait [#allocation13], 1024  }
  0x50   :  { %3477 = vsyncadd [#allocation13], 4294966272 }
  0x51   :  { %133 = sfence }
  0x52   :  { %v2986_v0 = vld [vmem:[#allocation6 + $0xe4] ss:$16 sps:$4 sm:$0xff]   ;;  %v2988_v1 = vld [vmem:[#allocation6 + $0xec] ss:$16 sps:$4 sm:$0xff]   ;;  %v3491_v2 = vmov 0   ;;  %s135_s8 = sld [smem:[#allocation2]] }
  0x53   :  { %397 = vmatprep.mubr.bf16.mxu0 %v3491_v2  ;;  %440 = vmatprep.mubr.bf16.mxu1 %v3491_v2  ;;  %v2990_v3 = vld [vmem:[#allocation6 + $0xe0] ss:$16 sps:$4 sm:$0xff]   ;;  %v2991_v4 = vld [vmem:[#allocation6 + $0xe8] ss:$16 sps:$4 sm:$0xff]   ;;  %v2992_v5 = vld [vmem:[#allocation6 + $0xc4] ss:$16 sps:$4 sm:$0xff]  }
  0x54   :  { %365 = vmatprep.subr.bf16.mxu0 %v2986_v0  ;;  %408 = vmatprep.subr.bf16.mxu1 %v2988_v1  ;;  %v2994_v6 = vld [vmem:[#allocation6 + $0xcc] ss:$16 sps:$4 sm:$0xff]   ;;  %v2996_v7 = vld [vmem:[#allocation6 + $0xc0] ss:$16 sps:$4 sm:$0xff]   ;;  %v2997_v8 = vld [vmem:[#allocation6 + $0xc8] ss:$16 sps:$4 sm:$0xff]  }
  0x55   :  { %366 = vmatpush1.bf16.msra.mxu0 %v2990_v3  ;;  %409 = vmatpush1.bf16.msra.mxu1 %v2991_v4  ;;  %v2998_v9 = vld [vmem:[#allocation6 + $0xa4] ss:$16 sps:$4 sm:$0xff]   ;;  %v3000_v10 = vld [vmem:[#allocation6 + $0xac] ss:$16 sps:$4 sm:$0xff]   ;;  %v3002_v11 = vld [vmem:[#allocation6 + $0xa0] ss:$16 sps:$4 sm:$0xff]  }
  0x56   :  { %367 = vmatprep.subr.bf16.mxu0 %v2992_v5  ;;  %410 = vmatprep.subr.bf16.mxu1 %v2994_v6  ;;  %v3003_v12 = vld [vmem:[#allocation6 + $0xa8] ss:$16 sps:$4 sm:$0xff]   ;;  %v3004_v13 = vld [vmem:[#allocation6 + $0x84] ss:$16 sps:$4 sm:$0xff]   ;;  %v3006_v14 = vld [vmem:[#allocation6 + $0x8c] ss:$16 sps:$4 sm:$0xff]  }
  0x57   :  { %v3008_v15 = vld [vmem:[#allocation6 + $0x80] ss:$16 sps:$4 sm:$0xff]   ;;  %v3009_v16 = vld [vmem:[#allocation6 + $0x88] ss:$16 sps:$4 sm:$0xff]   ;;  %v3010_v17 = vld [vmem:[#allocation6 + $0x64] ss:$16 sps:$4 sm:$0xff]  }
  0x58   :  { %v3012_v18 = vld [vmem:[#allocation6 + $0x6c] ss:$16 sps:$4 sm:$0xff]   ;;  %v3014_v19 = vld [vmem:[#allocation6 + $0x60] ss:$16 sps:$4 sm:$0xff]   ;;  %v3015_v20 = vld [vmem:[#allocation6 + $0x68] ss:$16 sps:$4 sm:$0xff]  }
  0x59   :  { %368 = vmatpush1.bf16.msra.mxu0 %v2996_v7  ;;  %411 = vmatpush1.bf16.msra.mxu1 %v2997_v8  ;;  %v3016_v21 = vld [vmem:[#allocation6 + $0x44] ss:$16 sps:$4 sm:$0xff]   ;;  %v3018_v22 = vld [vmem:[#allocation6 + $0x4c] ss:$16 sps:$4 sm:$0xff]   ;;  %v3020_v23 = vld [vmem:[#allocation6 + $0x40] ss:$16 sps:$4 sm:$0xff]  }
  0x5a   :  { %369 = vmatprep.subr.bf16.mxu0 %v2998_v9  ;;  %412 = vmatprep.subr.bf16.mxu1 %v3000_v10  ;;  %v3021_v24 = vld [vmem:[#allocation6 + $0x48] ss:$16 sps:$4 sm:$0xff]   ;;  %v3022_v25 = vld [vmem:[#allocation6 + $0x24] ss:$16 sps:$4 sm:$0xff]   ;;  %v3024_v26 = vld [vmem:[#allocation6 + $0x2c] ss:$16 sps:$4 sm:$0xff]  }
  0x5b   :  { %v3026_v27 = vld [vmem:[#allocation6 + $0x20] ss:$16 sps:$4 sm:$0xff]   ;;  %v3027_v28 = vld [vmem:[#allocation6 + $0x28] ss:$16 sps:$4 sm:$0xff]   ;;  %v3028_v29 = vld [vmem:[#allocation6 + $0x4] ss:$16 sps:$4 sm:$0xff]  }
  0x5c   :  { %v3030_v30 = vld [vmem:[#allocation6 + $0xc] ss:$16 sps:$4 sm:$0xff]   ;;  %v3032_v31 = vld [vmem:[#allocation6] ss:$16 sps:$4 sm:$0xff]   ;;  %v3033_v32 = vld [vmem:[#allocation6 + $0x8] ss:$16 sps:$4 sm:$0xff]  }
  0x5d   :  { %370 = vmatpush1.bf16.msra.mxu0 %v3002_v11  ;;  %413 = vmatpush1.bf16.msra.mxu1 %v3003_v12  ;;  %v3037_v33 = vld [vmem:[#allocation8 + $0x74] ss:$8 sps:$4 sm:$0xff]   ;;  %v3035_v36 = vld [vmem:[#allocation8 + $0x70] ss:$8 sps:$4 sm:$0xff]   ;;  %v3043_v38 = vld [vmem:[#allocation8 + $0x64] ss:$8 sps:$4 sm:$0xff]  }
  0x5e   :  { %371 = vmatprep.subr.bf16.mxu0 %v3004_v13  ;;  %414 = vmatprep.subr.bf16.mxu1 %v3006_v14  ;;  %v3040_v34 = vld [vmem:[#allocation8 + $0x174] ss:$8 sps:$4 sm:$0xff]   ;;  %v3038_v37 = vld [vmem:[#allocation8 + $0x170] ss:$8 sps:$4 sm:$0xff]   ;;  %v3046_v39 = vld [vmem:[#allocation8 + $0x164] ss:$8 sps:$4 sm:$0xff]  }
  0x5f   :  { %v3034_v35 = vld [vmem:[#allocation5] sm:$0xff]   ;;  %v3041_v40 = vld [vmem:[#allocation8 + $0x60] ss:$8 sps:$4 sm:$0xff]   ;;  %v3055_v46 = vld [vmem:[#allocation8 + $0x44] ss:$8 sps:$4 sm:$0xff]   ;;  %s2549_s30 = sld [smem:[#allocation2 + $0x1]] }
  0x60   :  { %v3044_v41 = vld [vmem:[#allocation8 + $0x160] ss:$8 sps:$4 sm:$0xff]   ;;  %v3049_v42 = vld [vmem:[#allocation8 + $0x54] ss:$8 sps:$4 sm:$0xff]   ;;  %v3047_v44 = vld [vmem:[#allocation8 + $0x50] ss:$8 sps:$4 sm:$0xff]  }
  0x61   :  { %372 = vmatpush1.bf16.msra.mxu0 %v3008_v15  ;;  %415 = vmatpush1.bf16.msra.mxu1 %v3009_v16  ;;  %v3052_v43 = vld [vmem:[#allocation8 + $0x154] ss:$8 sps:$4 sm:$0xff]   ;;  %v3050_v45 = vld [vmem:[#allocation8 + $0x150] ss:$8 sps:$4 sm:$0xff]   ;;  %v3058_v47 = vld [vmem:[#allocation8 + $0x144] ss:$8 sps:$4 sm:$0xff]  }
  0x62   :  { %373 = vmatprep.subr.bf16.mxu0 %v3010_v17  ;;  %416 = vmatprep.subr.bf16.mxu1 %v3012_v18  ;;  %v3053_v48 = vld [vmem:[#allocation8 + $0x40] ss:$8 sps:$4 sm:$0xff]   ;;  %v3061_v50 = vld [vmem:[#allocation8 + $0x34] ss:$8 sps:$4 sm:$0xff]   ;;  %v3059_v52 = vld [vmem:[#allocation8 + $0x30] ss:$8 sps:$4 sm:$0xff]  }
  0x63   :  { %v3056_v49 = vld [vmem:[#allocation8 + $0x140] ss:$8 sps:$4 sm:$0xff]   ;;  %v3064_v51 = vld [vmem:[#allocation8 + $0x134] ss:$8 sps:$4 sm:$0xff]   ;;  %v3062_v53 = vld [vmem:[#allocation8 + $0x130] ss:$8 sps:$4 sm:$0xff]  }
  0x64   :  { %v3067_v54 = vld [vmem:[#allocation8 + $0x24] ss:$8 sps:$4 sm:$0xff]   ;;  %v3065_v56 = vld [vmem:[#allocation8 + $0x20] ss:$8 sps:$4 sm:$0xff]   ;;  %v3073_v58 = vld [vmem:[#allocation8 + $0x14] ss:$8 sps:$4 sm:$0xff]  }
  0x65   :  { %374 = vmatpush1.bf16.msra.mxu0 %v3014_v19  ;;  %417 = vmatpush1.bf16.msra.mxu1 %v3015_v20  ;;  %v3070_v55 = vld [vmem:[#allocation8 + $0x124] ss:$8 sps:$4 sm:$0xff]   ;;  %v3068_v57 = vld [vmem:[#allocation8 + $0x120] ss:$8 sps:$4 sm:$0xff]   ;;  %v3076_v59 = vld [vmem:[#allocation8 + $0x114] ss:$8 sps:$4 sm:$0xff]  }
  0x66   :  { %375 = vmatprep.subr.bf16.mxu0 %v3016_v21  ;;  %418 = vmatprep.subr.bf16.mxu1 %v3018_v22  ;;  %v3071_v60 = vld [vmem:[#allocation8 + $0x10] ss:$8 sps:$4 sm:$0xff]   ;;  %v3079_v62 = vld [vmem:[#allocation8 + $0x4] ss:$8 sps:$4 sm:$0xff]   ;;  %v3077_v0 = vld [vmem:[#allocation8] ss:$8 sps:$4 sm:$0xff]  }
  0x67   :  { %v3074_v61 = vld [vmem:[#allocation8 + $0x110] ss:$8 sps:$4 sm:$0xff]   ;;  %v3082_v63 = vld [vmem:[#allocation8 + $0x104] ss:$8 sps:$4 sm:$0xff]   ;;  %v3080_v1 = vld [vmem:[#allocation8 + $0x100] ss:$8 sps:$4 sm:$0xff]  }
  0x68   :  { %v3085_v3 = vld [vmem:[#allocation8 + $0xf4] ss:$8 sps:$4 sm:$0xff]   ;;  %v3083_v5 = vld [vmem:[#allocation8 + $0xf0] ss:$8 sps:$4 sm:$0xff]   ;;  %v3091_v7 = vld [vmem:[#allocation8 + $0xe4] ss:$8 sps:$4 sm:$0xff]  }
  0x69   :  { %376 = vmatpush1.bf16.msra.mxu0 %v3020_v23  ;;  %419 = vmatpush1.bf16.msra.mxu1 %v3021_v24  ;;  %v3088_v4 = vld [vmem:[#allocation8 + $0x1f4] ss:$8 sps:$4 sm:$0xff]   ;;  %v3086_v6 = vld [vmem:[#allocation8 + $0x1f0] ss:$8 sps:$4 sm:$0xff]   ;;  %v3094_v8 = vld [vmem:[#allocation8 + $0x1e4] ss:$8 sps:$4 sm:$0xff]  }
  0x6a   :  { %377 = vmatprep.subr.bf16.mxu0 %v3022_v25  ;;  %420 = vmatprep.subr.bf16.mxu1 %v3024_v26  ;;  %v3089_v9 = vld [vmem:[#allocation8 + $0xe0] ss:$8 sps:$4 sm:$0xff]   ;;  %v3097_v11 = vld [vmem:[#allocation8 + $0xd4] ss:$8 sps:$4 sm:$0xff]   ;;  %v3095_v13 = vld [vmem:[#allocation8 + $0xd0] ss:$8 sps:$4 sm:$0xff]  }
  0x6b   :  { %v3092_v10 = vld [vmem:[#allocation8 + $0x1e0] ss:$8 sps:$4 sm:$0xff]   ;;  %v3100_v12 = vld [vmem:[#allocation8 + $0x1d4] ss:$8 sps:$4 sm:$0xff]   ;;  %v3098_v14 = vld [vmem:[#allocation8 + $0x1d0] ss:$8 sps:$4 sm:$0xff]  }
  0x6c   :  { %v3103_v15 = vld [vmem:[#allocation8 + $0xc4] ss:$8 sps:$4 sm:$0xff]   ;;  %v3101_v17 = vld [vmem:[#allocation8 + $0xc0] ss:$8 sps:$4 sm:$0xff]   ;;  %v3109_v19 = vld [vmem:[#allocation8 + $0xb4] ss:$8 sps:$4 sm:$0xff]  }
  0x6d   :  { %378 = vmatpush1.bf16.msra.mxu0 %v3026_v27  ;;  %421 = vmatpush1.bf16.msra.mxu1 %v3027_v28  ;;  %v3106_v16 = vld [vmem:[#allocation8 + $0x1c4] ss:$8 sps:$4 sm:$0xff]   ;;  %v3104_v18 = vld [vmem:[#allocation8 + $0x1c0] ss:$8 sps:$4 sm:$0xff]   ;;  %v3112_v20 = vld [vmem:[#allocation8 + $0x1b4] ss:$8 sps:$4 sm:$0xff]  }
  0x6e   :  { %379 = vmatprep.subr.bf16.mxu0 %v3028_v29  ;;  %422 = vmatprep.subr.bf16.mxu1 %v3030_v30  ;;  %v3107_v21 = vld [vmem:[#allocation8 + $0xb0] ss:$8 sps:$4 sm:$0xff]   ;;  %v3115_v23 = vld [vmem:[#allocation8 + $0xa4] ss:$8 sps:$4 sm:$0xff]   ;;  %v3113_v25 = vld [vmem:[#allocation8 + $0xa0] ss:$8 sps:$4 sm:$0xff]  }
  0x6f   :  { %v3110_v22 = vld [vmem:[#allocation8 + $0x1b0] ss:$8 sps:$4 sm:$0xff]   ;;  %v3118_v24 = vld [vmem:[#allocation8 + $0x1a4] ss:$8 sps:$4 sm:$0xff]   ;;  %v3116_v26 = vld [vmem:[#allocation8 + $0x1a0] ss:$8 sps:$4 sm:$0xff]  }
  0x70   :  { %v3121_v27 = vld [vmem:[#allocation8 + $0x94] ss:$8 sps:$4 sm:$0xff]   ;;  %v3119_v29 = vld [vmem:[#allocation8 + $0x90] ss:$8 sps:$4 sm:$0xff]   ;;  %vm3493_vm6 = vmmov 0   ;;  %s2550_s16 = sld [smem:[#allocation2 + $0x2]] }
  0x71   :  { %380 = vmatpush1.bf16.msra.mxu0 %v3032_v31  ;;  %423 = vmatpush1.bf16.msra.mxu1 %v3033_v32  ;;  %v3124_v28 = vld [vmem:[#allocation8 + $0x194] ss:$8 sps:$4 sm:$0xff]   ;;  %v3122_v30 = vld [vmem:[#allocation8 + $0x190] ss:$8 sps:$4 sm:$0xff]   ;;  %v3127_v31 = vld [vmem:[#allocation8 + $0x84] ss:$8 sps:$4 sm:$0xff]  }
  0x72   :  { %851 = vmatprep.subr.bf16.mxu0 %v3037_v33  ;;  %894 = vmatprep.subr.bf16.mxu1 %v3040_v34  ;;  %v3130_v32 = vld [vmem:[#allocation8 + $0x184] ss:$8 sps:$4 sm:$0xff]   ;;  %v3125_v33 = vld [vmem:[#allocation8 + $0x80] ss:$8 sps:$4 sm:$0xff]   ;;  %s2551_s18 = sld [smem:[#allocation2 + $0x3]]  ;;  %vm1364_vm11 = vcmask 15360  }
  0x73   :  { %v3128_v34 = vld [vmem:[#allocation8 + $0x180] ss:$8 sps:$4 sm:$0xff]  }
  0x74   :  { %398 = vmatmul.mubr.bf16.vlgmr.msra.gmra.mxu0 %v3034_v35  ;;  %441 = vmatmul.mubr.bf16.vlgmr.msra.gmra.mxu1 %v3034_v35  ;;  %v3131_v35 = vld [vmem:[#allocation9 + $0x78] sm:$0xff]  }
  0x75   :  { %852 = vmatpush1.bf16.msra.mxu0 %v3035_v36  ;;  %895 = vmatpush1.bf16.msra.mxu1 %v3038_v37 }
  0x76   :  { %853 = vmatprep.subr.bf16.mxu0 %v3043_v38  ;;  %896 = vmatprep.subr.bf16.mxu1 %v3046_v39 }
  0x79   :  { %854 = vmatpush1.bf16.msra.mxu0 %v3041_v40  ;;  %897 = vmatpush1.bf16.msra.mxu1 %v3044_v41  ;;  %v136_v40 = vstv %s135_s8 }
  0x7a   :  { %855 = vmatprep.subr.bf16.mxu0 %v3049_v42  ;;  %898 = vmatprep.subr.bf16.mxu1 %v3052_v43  ;;  %v3594_v43 = vpack.c.bf16 %v136_v40, %v136_v40 }
  0x7d   :  { %856 = vmatpush1.bf16.msra.mxu0 %v3047_v44  ;;  %899 = vmatpush1.bf16.msra.mxu1 %v3050_v45 }
  0x7e   :  { %857 = vmatprep.subr.bf16.mxu0 %v3055_v46  ;;  %900 = vmatprep.subr.bf16.mxu1 %v3058_v47 }
  0x81   :  { %858 = vmatpush1.bf16.msra.mxu0 %v3053_v48  ;;  %901 = vmatpush1.bf16.msra.mxu1 %v3056_v49 }
  0x82   :  { %859 = vmatprep.subr.bf16.mxu0 %v3061_v50  ;;  %902 = vmatprep.subr.bf16.mxu1 %v3064_v51 }
  0x85   :  { %860 = vmatpush1.bf16.msra.mxu0 %v3059_v52  ;;  %903 = vmatpush1.bf16.msra.mxu1 %v3062_v53 }
  0x86   :  { %861 = vmatprep.subr.bf16.mxu0 %v3067_v54  ;;  %904 = vmatprep.subr.bf16.mxu1 %v3070_v55  ;;  %v3132_v54 = vld [vmem:[#allocation9 + $0x38] sm:$0xff]  }
  0x89   :  { %862 = vmatpush1.bf16.msra.mxu0 %v3065_v56  ;;  %905 = vmatpush1.bf16.msra.mxu1 %v3068_v57  ;;  %v3133_v57 = vld [vmem:[#allocation9 + $0x70] sm:$0xff]  }
  0x8a   :  { %863 = vmatprep.subr.bf16.mxu0 %v3073_v58  ;;  %906 = vmatprep.subr.bf16.mxu1 %v3076_v59 }
  0x8d   :  { %864 = vmatpush1.bf16.msra.mxu0 %v3071_v60  ;;  %907 = vmatpush1.bf16.msra.mxu1 %v3074_v61  ;;  %v3134_v60 = vld [vmem:[#allocation9 + $0x30] sm:$0xff]   ;;  %v3135_v61 = vld [vmem:[#allocation9 + $0x68] sm:$0xff]  }
  0x8e   :  { %865 = vmatprep.subr.bf16.mxu0 %v3079_v62  ;;  %908 = vmatprep.subr.bf16.mxu1 %v3082_v63  ;;  %v3136_v62 = vld [vmem:[#allocation9 + $0x28] sm:$0xff]   ;;  %v3137_v63 = vld [vmem:[#allocation9 + $0x60] sm:$0xff]  }
  0x91   :  { %866 = vmatpush1.bf16.msra.mxu0 %v3077_v0  ;;  %909 = vmatpush1.bf16.msra.mxu1 %v3080_v1  ;;  %v3138_v0 = vld [vmem:[#allocation9 + $0x20] sm:$0xff]   ;;  %v3139_v1 = vld [vmem:[#allocation9 + $0x58] sm:$0xff]  }
  0x92   :  { %867 = vmatprep.subr.bf16.mxu0 %v3085_v3  ;;  %910 = vmatprep.subr.bf16.mxu1 %v3088_v4  ;;  %v3140_v3 = vld [vmem:[#allocation9 + $0x18] sm:$0xff]   ;;  %v3141_v4 = vld [vmem:[#allocation9 + $0x50] sm:$0xff]  }
  0x95   :  { %868 = vmatpush2.bf16.msra.mxu0 %v3083_v5  ;;  %911 = vmatpush2.bf16.msra.mxu1 %v3086_v6  ;;  %v3142_v5 = vld [vmem:[#allocation9 + $0x10] sm:$0xff]   ;;  %v3143_v6 = vld [vmem:[#allocation9 + $0x48] sm:$0xff]  }
  0x96   :  { %869 = vmatprep.subr.bf16.mxu0 %v3091_v7  ;;  %912 = vmatprep.subr.bf16.mxu1 %v3094_v8  ;;  %v3144_v7 = vld [vmem:[#allocation9 + $0x8] sm:$0xff]   ;;  %v3145_v8 = vld [vmem:[#allocation9 + $0x40] sm:$0xff]  }
  0x99   :  { %870 = vmatpush2.bf16.msra.mxu0 %v3089_v9  ;;  %913 = vmatpush2.bf16.msra.mxu1 %v3092_v10  ;;  %v3146_v9 = vld [vmem:[#allocation9] sm:$0xff]   ;;  %v3147_v10 = vld [vmem:[#allocation11 + $0x38] sm:$0xff]  }
  0x9a   :  { %871 = vmatprep.subr.bf16.mxu0 %v3097_v11  ;;  %914 = vmatprep.subr.bf16.mxu1 %v3100_v12  ;;  %v3492_v11 = vmov 0.0   ;;  %v3148_v12 = vld [vmem:[#allocation11 + $0x30] sm:$0xff]  }
  0x9d   :  { %872 = vmatpush2.bf16.msra.mxu0 %v3095_v13  ;;  %915 = vmatpush2.bf16.msra.mxu1 %v3098_v14  ;;  %v3149_v13 = vld [vmem:[#allocation11 + $0x28] sm:$0xff]   ;;  %v3150_v14 = vld [vmem:[#allocation11 + $0x20] sm:$0xff]  }
  0x9e   :  { %873 = vmatprep.subr.bf16.mxu0 %v3103_v15  ;;  %916 = vmatprep.subr.bf16.mxu1 %v3106_v16  ;;  %v149_v15 = vlaneseq }
  0xa0   :  { %v150_v16 = vshrl.u32 %v149_v15, 7 }
  0xa1   :  { %874 = vmatpush2.bf16.msra.mxu0 %v3101_v17  ;;  %917 = vmatpush2.bf16.msra.mxu1 %v3104_v18  ;;  %v147_v18 = vld [vmem:[%s3717_s5] sm:$0x3] }
  0xa2   :  { %875 = vmatprep.subr.bf16.mxu0 %v3109_v19  ;;  %918 = vmatprep.subr.bf16.mxu1 %v3112_v20  ;;  %v3606_v17 = vsub.s32 0, %v150_v16  ;;  %v155_v19 = vsub.s32 1, %v150_v16  ;;  %v3163_v16 = vld [vmem:[#allocation12 + $0x10] sm:$0xff]  }
  0xa4   :  { %v152_v20 = vrot.slane %v147_v18, %v3606_v17 }
  0xa5   :  { %876 = vmatpush2.bf16.msra.mxu0 %v3107_v21  ;;  %919 = vmatpush2.bf16.msra.mxu1 %v3110_v22  ;;  %v156_v21 = vrot.slane %v147_v18, %v155_v19  ;;  %v3166_v18 = vld [vmem:[#allocation6 + $0xc4] ss:$16 sps:$4 sm:$0xff]   ;;  %v3164_v19 = vld [vmem:[#allocation6 + $0xc0] ss:$16 sps:$4 sm:$0xff]  }
  0xa6   :  { %877 = vmatprep.subr.bf16.mxu0 %v3115_v23  ;;  %920 = vmatprep.subr.bf16.mxu1 %v3118_v24  ;;  %v159_v22 = vpack.c.bf16 %v152_v20, %v152_v20  ;;  %v3167_v20 = vld [vmem:[#allocation12 + $0x8] sm:$0xff]  }
  0xa7   :  { %v160_v23 = vpack.c.bf16 %v156_v21, %v156_v21  ;;  %v3170_v21 = vld [vmem:[#allocation6 + $0xa4] ss:$16 sps:$4 sm:$0xff]  }
  0xa9   :  { %878 = vmatpush2.bf16.msra.mxu0 %v3113_v25  ;;  %921 = vmatpush2.bf16.msra.mxu1 %v3116_v26  ;;  %v940_v26 = vpack.i.b16 %v159_v22, %v159_v22  ;;  %v3168_v22 = vld [vmem:[#allocation6 + $0xa0] ss:$16 sps:$4 sm:$0xff]  }
  0xaa   :  { %879 = vmatprep.subr.bf16.mxu0 %v3121_v27  ;;  %922 = vmatprep.subr.bf16.mxu1 %v3124_v28 }
  0xad   :  { %880 = vmatpush2.bf16.msra.mxu0 %v3119_v29  ;;  %923 = vmatpush2.bf16.msra.mxu1 %v3122_v30  ;;  %v947_v29 = vpack.i.b16 %v160_v23, %v160_v23  ;;  %v3171_v23 = vld [vmem:[#allocation12] sm:$0xff]  }
  0xae   :  { %881 = vmatprep.subr.bf16.mxu0 %v3127_v31  ;;  %924 = vmatprep.subr.bf16.mxu1 %v3130_v32 }
  0xb1   :  { %882 = vmatpush2.bf16.msra.mxu0 %v3125_v33  ;;  %925 = vmatpush2.bf16.msra.mxu1 %v3128_v34  ;;  %v3613_v34 = vrot.slane %v940_v26, %v3606_v17  ;;  %v3177_v26 = vld [vmem:[#allocation6 + $0xec] ss:$16 sps:$4 sm:$0xff]  }
  0xb2   :  { %2810 = vmatprep.subr.bf16.mxu0 %v3131_v35  ;;  %2890 = vmatprep.subr.bf16.mxu1 %v3492_v11  ;;  %v139_v35 = vstv %s2549_s30 }
 0x134   :  { %v399_v36 = vpop.f32.mrf.mxu0  ;;  %v442_v37 = vpop.f32.mrf.mxu1 }
 0x136   :  { %v401_v38 = vpop.f32.mrf.mxu0  ;;  %v444_v39 = vpop.f32.mrf.mxu1 }
 0x138   :  { %v403_v41 = vpop.f32.mrf.mxu0  ;;  %v446_v42 = vpop.f32.mrf.mxu1 }
 0x139   :  { %v451_v44 = vpack.c.bf16 %v403_v41, %v399_v36  ;;  %v453_v45 = vpack.c.bf16 %v446_v42, %v442_v37  ;;  %v3616_v41 = vrot.slane %v947_v29, %v3606_v17  ;;  %v3618_v42 = vpack.c.bf16 %v139_v35, %v139_v35  ;;  %v3184_v29 = vld [vmem:[#allocation6 + $0x40] ss:$16 sps:$4 sm:$0xff]   ;;  %v3198_v35 = vld [vmem:[#allocation6 + $0x4] ss:$16 sps:$4 sm:$0xff]  }
 0x13a   :  { %v405_v46 = vpop.f32.mrf.mxu0  ;;  %v448_v47 = vpop.f32.mrf.mxu1 }
 0x13b   :  { %v452_v48 = vpack.c.bf16 %v405_v46, %v401_v38  ;;  %v454_v49 = vpack.c.bf16 %v448_v47, %v444_v39  ;;  %vm455_vm0 = vcmp.gt.bf16.partialorder %v451_v44, 0  ;;  %v459_v50 = vmul.bf16 %v451_v44, %v3594_v43 }
 0x13c   :  { %vm457_vm1 = vcmp.gt.bf16.partialorder %v453_v45, 0  ;;  %v461_v51 = vmul.bf16 %v453_v45, %v3594_v43 }
 0x13d   :  { %v460_v52 = vmul.bf16 %v452_v48, %v3594_v43  ;;  %v462_v53 = vmul.bf16 %v454_v49, %v3594_v43  ;;  %vm456_vm2 = vcmp.gt.bf16.partialorder %v452_v48, 0  ;;  %vm458_vm3 = vcmp.gt.bf16.partialorder %v454_v49, 0 }
 0x13e   :  { %v463_v58 = vsel %vm455_vm0, %v451_v44, %v459_v50  ;;  %v465_v59 = vsel %vm457_vm1, %v453_v45, %v461_v51  ;;  %v3151_v51 = vld [vmem:[#allocation11 + $0x18] sm:$0xff]  }
 0x13f   :  { %v464_v55 = vsel %vm456_vm2, %v452_v48, %v460_v52  ;;  %v466_v56 = vsel %vm458_vm3, %v454_v49, %v462_v53  ;;  %v3152_v52 = vld [vmem:[#allocation11 + $0x10] sm:$0xff]   ;;  %v3153_v53 = vld [vmem:[#allocation11 + $0x8] sm:$0xff]  }
 0x140   :  { %883 = vmatprep.mubr.bf16.mxu0 %v464_v55  ;;  %926 = vmatprep.mubr.bf16.mxu1 %v466_v56  ;;  %v3155_v55 = vld [vmem:[#allocation12 + $0x38] sm:$0xff]   ;;  %v3156_v56 = vld [vmem:[#allocation12 + $0x30] sm:$0xff]  }
 0x141   :  { %884 = vmatmul.mubr.bf16.vlgmr.msra.gmra.mxu0 %v463_v58  ;;  %927 = vmatmul.mubr.bf16.vlgmr.msra.gmra.mxu1 %v465_v59  ;;  %v3157_v58 = vld [vmem:[#allocation12 + $0x28] sm:$0xff]   ;;  %v3158_v59 = vld [vmem:[#allocation12 + $0x20] sm:$0xff]  }
 0x142   :  { %2811 = vmatpush3.bf16.msra.mxu0 %v3132_v54  ;;  %2891 = vmatpush3.bf16.msra.mxu1 %v3147_v10  ;;  %v3154_v54 = vld [vmem:[#allocation11] sm:$0xff]  }
 0x143   :  { %2812 = vmatprep.subr.bf16.mxu0 %v3133_v57  ;;  %2892 = vmatprep.subr.bf16.mxu1 %v3492_v11  ;;  %v3162_v57 = vld [vmem:[#allocation6 + $0xe4] ss:$16 sps:$4 sm:$0xff]  }
 0x144   :  { %2906 = vmatprep.mubr.msk.bf16.mxu1 %vm3493_vm6, %v3492_v11 }
 0x146   :  { %2813 = vmatpush3.bf16.msra.mxu0 %v3134_v60  ;;  %2893 = vmatpush3.bf16.msra.mxu1 %v3148_v12  ;;  %v3159_v60 = vld [vmem:[#allocation12 + $0x18] sm:$0xff]  }
 0x147   :  { %2814 = vmatprep.subr.bf16.mxu0 %v3135_v61  ;;  %2894 = vmatprep.subr.bf16.mxu1 %v3492_v11  ;;  %v161_v61 = vld [vmem:[%s3719_s7] sm:$0x1] }
 0x14a   :  { %2815 = vmatpush3.bf16.msra.mxu0 %v3136_v62  ;;  %2895 = vmatpush3.bf16.msra.mxu1 %v3149_v13  ;;  %v162_v62 = vpack.c.bf16 %v161_v61, %v161_v61 }
 0x14b   :  { %2816 = vmatprep.subr.bf16.mxu0 %v3137_v63  ;;  %2896 = vmatprep.subr.bf16.mxu1 %v3492_v11 }
 0x14e   :  { %2817 = vmatpush3.bf16.msra.mxu0 %v3138_v0  ;;  %2897 = vmatpush3.bf16.msra.mxu1 %v3150_v14  ;;  %v3160_v14 = vld [vmem:[#allocation6 + $0xe0] ss:$16 sps:$4 sm:$0xff]  }
 0x14f   :  { %2818 = vmatprep.subr.bf16.mxu0 %v3139_v1  ;;  %2898 = vmatprep.subr.bf16.mxu1 %v3492_v11  ;;  %v1132_v1 = vpack.i.b16 %v162_v62, %v162_v62 }
 0x152   :  { %2819 = vmatpush3.bf16.msra.mxu0 %v3140_v3  ;;  %2899 = vmatpush3.bf16.msra.mxu1 %v3151_v51  ;;  %v3233_v51 = vld [vmem:[#allocation8 + $0x20] ss:$8 sps:$4 sm:$0xff]  }
 0x153   :  { %2820 = vmatprep.subr.bf16.mxu0 %v3141_v4  ;;  %2900 = vmatprep.subr.bf16.mxu1 %v3492_v11 }
 0x156   :  { %2821 = vmatpush3.bf16.msra.mxu0 %v3142_v5  ;;  %2901 = vmatpush3.bf16.msra.mxu1 %v3152_v52  ;;  %v142_v5 = vstv %s2550_s16  ;;  %v3241_v52 = vld [vmem:[#allocation8 + $0x14] ss:$8 sps:$4 sm:$0xff]  }
 0x157   :  { %2822 = vmatprep.subr.bf16.mxu0 %v3143_v6  ;;  %2902 = vmatprep.subr.bf16.mxu1 %v3492_v11  ;;  %v3642_v10 = vpack.c.bf16 %v142_v5, %v142_v5 }
 0x15a   :  { %2823 = vmatpush3.bf16.msra.mxu0 %v3144_v7  ;;  %2903 = vmatpush3.bf16.msra.mxu1 %v3153_v53  ;;  %v3239_v53 = vld [vmem:[#allocation8 + $0x10] ss:$8 sps:$4 sm:$0xff]  }
 0x15b   :  { %2824 = vmatprep.subr.bf16.mxu0 %v3145_v8  ;;  %2904 = vmatprep.subr.bf16.mxu1 %v3492_v11  ;;  %v3640_v8 = vrot.slane %v1132_v1, %v3606_v17 }
 0x15e   :  { %2825 = vmatpush3.bf16.msra.mxu0 %v3146_v9  ;;  %2905 = vmatpush3.bf16.msra.mxu1 %v3154_v54  ;;  %v3247_v54 = vld [vmem:[#allocation8 + $0x4] ss:$8 sps:$4 sm:$0xff]  }
 0x15f   :  { %2910 = vmatprep.subr.bf16.mxu0 %v3492_v11  ;;  %1567 = vmatprep.subr.bf16.mxu1 %v3162_v57  ;;  %v3251_v57 = vld [vmem:[#allocation8 + $0xf0] ss:$8 sps:$4 sm:$0xff]  }
 0x201   :  { %v885_v24 = vpop.f32.mrf.mxu0  ;;  %v928_v25 = vpop.f32.mrf.mxu1 }
 0x202   :  { %v929_v32 = vadd.f32 %v928_v25, %v885_v24  ;;  %v3174_v24 = vld [vmem:[#allocation6 + $0x84] ss:$16 sps:$4 sm:$0xff]   ;;  %v3172_v25 = vld [vmem:[#allocation6 + $0x80] ss:$16 sps:$4 sm:$0xff]  }
 0x203   :  { %v887_v27 = vpop.f32.mrf.mxu0  ;;  %v930_v28 = vpop.f32.mrf.mxu1 }
 0x204   :  { %v931_v38 = vadd.f32 %v930_v28, %v887_v27  ;;  %v3180_v27 = vld [vmem:[#allocation6 + $0x64] ss:$16 sps:$4 sm:$0xff]   ;;  %v3178_v28 = vld [vmem:[#allocation6 + $0x60] ss:$16 sps:$4 sm:$0xff]  }
 0x205   :  { %v889_v30 = vpop.f32.mrf.mxu0  ;;  %v932_v31 = vpop.f32.mrf.mxu1 }
 0x206   :  { %v933_v33 = vadd.f32 %v932_v31, %v889_v30  ;;  %v3186_v30 = vld [vmem:[#allocation6 + $0x44] ss:$16 sps:$4 sm:$0xff]   ;;  %v3190_v31 = vld [vmem:[#allocation6 + $0x20] ss:$16 sps:$4 sm:$0xff]  }
 0x207   :  { %v891_v36 = vpop.f32.mrf.mxu0  ;;  %v934_v37 = vpop.f32.mrf.mxu1 }
 0x208   :  { %v937_v39 = vpack.c.bf16 %v933_v33, %v929_v32  ;;  %v935_v40 = vadd.f32 %v934_v37, %v891_v36  ;;  %v3192_v32 = vld [vmem:[#allocation6 + $0x24] ss:$16 sps:$4 sm:$0xff]   ;;  %v3196_v33 = vld [vmem:[#allocation6] ss:$16 sps:$4 sm:$0xff]   ;;  %v3649_v36 = vld [vmem:[#allocation5 + $0x8] sm:$0xff]  }
 0x209   :  { %v3212_v37 = vld [vmem:[#allocation8 + $0x70] ss:$8 sps:$4 sm:$0xff]  }
 0x20a   :  { %v953_v44 = vadd.bf16 %v3613_v34, %v937_v39  ;;  %v938_v45 = vpack.c.bf16 %v935_v40, %v931_v38  ;;  %v3214_v38 = vld [vmem:[#allocation8 + $0x74] ss:$8 sps:$4 sm:$0xff]   ;;  %v3217_v39 = vld [vmem:[#allocation8 + $0x64] ss:$8 sps:$4 sm:$0xff]   ;;  %v3215_v40 = vld [vmem:[#allocation8 + $0x60] ss:$8 sps:$4 sm:$0xff]  }
 0x20c   :  { %v954_v46 = vadd.bf16 %v3616_v41, %v938_v45  ;;  %v957_v47 = vmul.bf16 %v953_v44, %v3618_v42  ;;  %vm955_vm5 = vcmp.gt.bf16.partialorder %v953_v44, 0  ;;  %v3218_v45 = vld [vmem:[#allocation8 + $0x50] ss:$8 sps:$4 sm:$0xff]  }
 0x20e   :  { %vm956_vm4 = vcmp.gt.bf16.partialorder %v954_v46, 0  ;;  %v958_v48 = vmul.bf16 %v954_v46, %v3618_v42  ;;  %v959_v50 = vsel %vm955_vm5, %v953_v44, %v957_v47  ;;  %v3220_v44 = vld [vmem:[#allocation8 + $0x54] ss:$8 sps:$4 sm:$0xff]   ;;  %v3221_v47 = vld [vmem:[#allocation8 + $0x40] ss:$8 sps:$4 sm:$0xff]  }
 0x210   :  { %v960_v49 = vsel %vm956_vm4, %v954_v46, %v958_v48  ;;  %v3223_v46 = vld [vmem:[#allocation8 + $0x44] ss:$8 sps:$4 sm:$0xff]   ;;  %v3229_v48 = vld [vmem:[#allocation8 + $0x34] ss:$8 sps:$4 sm:$0xff]  }
 0x211   :  { %1121 = vmatprep.mubr.bf16.mxu0 %v960_v49  ;;  %v3227_v49 = vld [vmem:[#allocation8 + $0x30] ss:$8 sps:$4 sm:$0xff]  }
 0x212   :  { %1122 = vmatmul.mubr.bf16.vlgmr.msra.gmra.mxu0 %v959_v50  ;;  %v3235_v50 = vld [vmem:[#allocation8 + $0x24] ss:$8 sps:$4 sm:$0xff]  }
 0x213   :  { %2926 = vmatprep.mubr.msk.bf16.mxu0 %vm3493_vm6, %v3492_v11  ;;  %2911 = vmatpush3.bf16.msra.mxu0 %v3155_v55  ;;  %v3245_v55 = vld [vmem:[#allocation8] ss:$8 sps:$4 sm:$0xff]  }
 0x214   :  { %2912 = vmatprep.subr.bf16.mxu0 %v3492_v11 }
 0x217   :  { %2913 = vmatpush3.bf16.msra.mxu0 %v3156_v56  ;;  %v3253_v56 = vld [vmem:[#allocation8 + $0xf4] ss:$8 sps:$4 sm:$0xff]  }
 0x218   :  { %2914 = vmatprep.subr.bf16.mxu0 %v3492_v11 }
 0x21b   :  { %2915 = vmatpush3.bf16.msra.mxu0 %v3157_v58  ;;  %v163_v58 = vld [vmem:[%s3721_s9] sm:$0x1] }
 0x21c   :  { %2916 = vmatprep.subr.bf16.mxu0 %v3492_v11 }
 0x21f   :  { %2917 = vmatpush3.bf16.msra.mxu0 %v3158_v59  ;;  %v164_v59 = vpack.c.bf16 %v163_v58, %v163_v58  ;;  %v3278_v58 = vld [vmem:[#allocation8 + $0x1e0] ss:$8 sps:$4 sm:$0xff]  }
 0x220   :  { %2918 = vmatprep.subr.bf16.mxu0 %v3492_v11 }
 0x223   :  { %2919 = vmatpush3.bf16.msra.mxu0 %v3159_v60  ;;  %v1249_v60 = vpack.i.b16 %v164_v59, %v164_v59  ;;  %v3281_v59 = vld [vmem:[#allocation8 + $0xa0] ss:$8 sps:$4 sm:$0xff]  }
 0x224   :  { %2920 = vmatprep.subr.bf16.mxu0 %v3492_v11 }
 0x227   :  { %2921 = vmatpush3.bf16.msra.mxu0 %v3163_v16  ;;  %v3195_v16 = vld [vmem:[#allocation6 + $0x8c] ss:$16 sps:$4 sm:$0xff]  }
 0x228   :  { %2922 = vmatprep.subr.bf16.mxu0 %v3492_v11 }
 0x22b   :  { %2923 = vmatpush3.bf16.msra.mxu0 %v3167_v20  ;;  %v3199_v20 = vld [vmem:[#allocation6 + $0x68] ss:$16 sps:$4 sm:$0xff]  }
 0x22c   :  { %2924 = vmatprep.subr.bf16.mxu0 %v3492_v11 }
 0x22f   :  { %2925 = vmatpush3.bf16.msra.mxu0 %v3171_v23  ;;  %v3208_v23 = vld [vmem:[#allocation6 + $0x2c] ss:$16 sps:$4 sm:$0xff]  }
 0x230   :  { %1610 = vmatprep.subr.bf16.mxu0 %v3177_v26  ;;  %v3226_v26 = vld [vmem:[#allocation8 + $0x174] ss:$8 sps:$4 sm:$0xff]  }
 0x2d2   :  { %v2826_v63 = vpop.f32.mrf.mxu0 }
 0x2d4   :  { %v2827_v0 = vpop.f32.mrf.mxu0 }
 0x2d5   :  { %v2828_v6 = vadd.f32 %v2827_v0, %v2826_v63  ;;  %v145_v63 = vstv %s2551_s18  ;;  %v3656_v0 = vrot.slane %v1249_v60, %v3606_v17  ;;  %v3189_v17 = vld [vmem:[#allocation6 + $0xac] ss:$16 sps:$4 sm:$0xff]  }
 0x2d6   :  { %v2829_v3 = vpop.f32.mrf.mxu0  ;;  %v3286_v60 = vld [vmem:[#allocation8 + $0x1d4] ss:$8 sps:$4 sm:$0xff]  }
 0x2d8   :  { %v2830_v4 = vpop.f32.mrf.mxu0 }
 0x2d9   :  { %v2831_v7 = vadd.f32 %v2830_v4, %v2829_v3  ;;  %v3658_v3 = vpack.c.bf16 %v145_v63, %v145_v63 }
 0x2db   :  { %v1130_v9 = vpack.c.bf16 %v2831_v7, %v2828_v6 }
 0x2dd   :  { %v1138_v12 = vadd.bf16 %v3640_v8, %v1130_v9  ;;  %v3175_v9 = vld [vmem:[#allocation6 + $0xe8] ss:$16 sps:$4 sm:$0xff]  }
 0x2df   :  { %vm1139_vm7 = vcmp.gt.bf16.partialorder %v1138_v12, 0  ;;  %v1140_v13 = vmul.bf16 %v1138_v12, %v3642_v10 }
 0x2e1   :  { %v1141_v15 = vsel %vm1139_vm7, %v1138_v12, %v1140_v13  ;;  %v3183_v12 = vld [vmem:[#allocation6 + $0xcc] ss:$16 sps:$4 sm:$0xff]  }
 0x2e2   :  { %2907 = vmatmul.mubr.bf16.vlgmr.msra.gmra.mxu1 %v1141_v15  ;;  %v3187_v15 = vld [vmem:[#allocation6 + $0xa8] ss:$16 sps:$4 sm:$0xff]  }
 0x2e3   :  { %1568 = vmatpush1.bf16.msra.mxu1 %v3160_v14  ;;  %1599 = vmatprep.mubr.bf16.mxu1 %v3491_v2  ;;  %v3181_v14 = vld [vmem:[#allocation6 + $0xc8] ss:$16 sps:$4 sm:$0xff]  }
 0x2e4   :  { %1569 = vmatprep.subr.bf16.mxu1 %v3166_v18  ;;  %v3193_v18 = vld [vmem:[#allocation6 + $0x88] ss:$16 sps:$4 sm:$0xff]  }
 0x2e7   :  { %1570 = vmatpush1.bf16.msra.mxu1 %v3164_v19  ;;  %v3201_v19 = vld [vmem:[#allocation6 + $0x6c] ss:$16 sps:$4 sm:$0xff]  }
 0x2e8   :  { %1571 = vmatprep.subr.bf16.mxu1 %v3170_v21  ;;  %v3205_v21 = vld [vmem:[#allocation6 + $0x4c] ss:$16 sps:$4 sm:$0xff]  }
 0x2eb   :  { %1572 = vmatpush1.bf16.msra.mxu1 %v3168_v22  ;;  %v3203_v22 = vld [vmem:[#allocation6 + $0x48] ss:$16 sps:$4 sm:$0xff]  }
 0x2ec   :  { %1573 = vmatprep.subr.bf16.mxu1 %v3174_v24  ;;  %v3211_v24 = vld [vmem:[#allocation6 + $0xc] ss:$16 sps:$4 sm:$0xff]  }
 0x2ef   :  { %1574 = vmatpush1.bf16.msra.mxu1 %v3172_v25  ;;  %v3209_v25 = vld [vmem:[#allocation6 + $0x8] ss:$16 sps:$4 sm:$0xff]  }
 0x2f0   :  { %1575 = vmatprep.subr.bf16.mxu1 %v3180_v27  ;;  %v3224_v27 = vld [vmem:[#allocation8 + $0x170] ss:$8 sps:$4 sm:$0xff]  }
 0x2f3   :  { %1576 = vmatpush1.bf16.msra.mxu1 %v3178_v28  ;;  %v3232_v28 = vld [vmem:[#allocation8 + $0x164] ss:$8 sps:$4 sm:$0xff]  }
 0x2f4   :  { %1577 = vmatprep.subr.bf16.mxu1 %v3186_v30  ;;  %v3238_v30 = vld [vmem:[#allocation8 + $0x154] ss:$8 sps:$4 sm:$0xff]  }
 0x2f7   :  { %1578 = vmatpush1.bf16.msra.mxu1 %v3184_v29  ;;  %v3230_v29 = vld [vmem:[#allocation8 + $0x160] ss:$8 sps:$4 sm:$0xff]  }
 0x2f8   :  { %1579 = vmatprep.subr.bf16.mxu1 %v3192_v32  ;;  %v3244_v32 = vld [vmem:[#allocation8 + $0x144] ss:$8 sps:$4 sm:$0xff]  }
 0x2fb   :  { %1580 = vmatpush1.bf16.msra.mxu1 %v3190_v31  ;;  %v3236_v31 = vld [vmem:[#allocation8 + $0x150] ss:$8 sps:$4 sm:$0xff]  }
 0x2fc   :  { %1581 = vmatprep.subr.bf16.mxu1 %v3198_v35  ;;  %v3250_v35 = vld [vmem:[#allocation8 + $0x134] ss:$8 sps:$4 sm:$0xff]  }
 0x2ff   :  { %1582 = vmatpush1.bf16.msra.mxu1 %v3196_v33  ;;  %v3242_v33 = vld [vmem:[#allocation8 + $0x140] ss:$8 sps:$4 sm:$0xff]  }
 0x300   :  { %2053 = vmatprep.subr.bf16.mxu1 %v3214_v38  ;;  %v3256_v38 = vld [vmem:[#allocation8 + $0x124] ss:$8 sps:$4 sm:$0xff]  }
 0x302   :  { %1600 = vmatmul.mubr.bf16.vlgmr.msra.gmra.mxu1 %v3649_v36 }
 0x303   :  { %2054 = vmatpush1.bf16.msra.mxu1 %v3212_v37  ;;  %v3248_v37 = vld [vmem:[#allocation8 + $0x130] ss:$8 sps:$4 sm:$0xff]  }
 0x304   :  { %2055 = vmatprep.subr.bf16.mxu1 %v3217_v39  ;;  %v3254_v39 = vld [vmem:[#allocation8 + $0x120] ss:$8 sps:$4 sm:$0xff]  }
 0x307   :  { %2056 = vmatpush1.bf16.msra.mxu1 %v3215_v40  ;;  %v3259_v40 = vld [vmem:[#allocation8 + $0xe4] ss:$8 sps:$4 sm:$0xff]  }
 0x308   :  { %2057 = vmatprep.subr.bf16.mxu1 %v3220_v44  ;;  %v3262_v44 = vld [vmem:[#allocation8 + $0x114] ss:$8 sps:$4 sm:$0xff]  }
 0x30b   :  { %2058 = vmatpush1.bf16.msra.mxu1 %v3218_v45  ;;  %v3260_v45 = vld [vmem:[#allocation8 + $0x110] ss:$8 sps:$4 sm:$0xff]  }
 0x30c   :  { %2059 = vmatprep.subr.bf16.mxu1 %v3223_v46  ;;  %v3265_v46 = vld [vmem:[#allocation8 + $0xd4] ss:$8 sps:$4 sm:$0xff]  }
 0x30f   :  { %2060 = vmatpush1.bf16.msra.mxu1 %v3221_v47  ;;  %v3263_v47 = vld [vmem:[#allocation8 + $0xd0] ss:$8 sps:$4 sm:$0xff]  }
 0x310   :  { %2061 = vmatprep.subr.bf16.mxu1 %v3229_v48  ;;  %v3266_v48 = vld [vmem:[#allocation8 + $0x100] ss:$8 sps:$4 sm:$0xff]  }
 0x313   :  { %2062 = vmatpush1.bf16.msra.mxu1 %v3227_v49  ;;  %v3268_v49 = vld [vmem:[#allocation8 + $0x104] ss:$8 sps:$4 sm:$0xff]  }
 0x314   :  { %2063 = vmatprep.subr.bf16.mxu1 %v3235_v50  ;;  %v3269_v50 = vld [vmem:[#allocation8 + $0xc0] ss:$8 sps:$4 sm:$0xff]  }
 0x317   :  { %2064 = vmatpush1.bf16.msra.mxu1 %v3233_v51  ;;  %v3271_v51 = vld [vmem:[#allocation8 + $0xc4] ss:$8 sps:$4 sm:$0xff]  }
 0x318   :  { %2065 = vmatprep.subr.bf16.mxu1 %v3241_v52  ;;  %v3274_v52 = vld [vmem:[#allocation8 + $0x1f4] ss:$8 sps:$4 sm:$0xff]  }
 0x31b   :  { %2066 = vmatpush1.bf16.msra.mxu1 %v3239_v53  ;;  %v3277_v53 = vld [vmem:[#allocation8 + $0xb4] ss:$8 sps:$4 sm:$0xff]  }
 0x31c   :  { %2067 = vmatprep.subr.bf16.mxu1 %v3247_v54  ;;  %v3272_v54 = vld [vmem:[#allocation8 + $0x1f0] ss:$8 sps:$4 sm:$0xff]  }
 0x31f   :  { %2068 = vmatpush1.bf16.msra.mxu1 %v3245_v55  ;;  %v3275_v55 = vld [vmem:[#allocation8 + $0xb0] ss:$8 sps:$4 sm:$0xff]  }
 0x320   :  { %2069 = vmatprep.subr.bf16.mxu1 %v3253_v56  ;;  %v3280_v56 = vld [vmem:[#allocation8 + $0x1e4] ss:$8 sps:$4 sm:$0xff]  }
 0x323   :  { %2070 = vmatpush2.bf16.msra.mxu1 %v3251_v57  ;;  %v3283_v57 = vld [vmem:[#allocation8 + $0xa4] ss:$8 sps:$4 sm:$0xff]  }
 0x324   :  { %2071 = vmatprep.subr.bf16.mxu1 %v3259_v40 }
 0x3a2   :  { %v1240_v61 = vpop.f32.mrf.mxu1 }
 0x3a4   :  { %v2908_v62 = vpop.f32.mrf.mxu1 }
 0x3a5   :  { %v3289_v62 = vld [vmem:[#allocation8 + $0x94] ss:$8 sps:$4 sm:$0xff]  }
 0x3a6   :  { %v1243_v1 = vpop.f32.mrf.mxu1 }
 0x3a7   :  { %v1247_v4 = vpack.c.bf16 %v1243_v1, %v1240_v61  ;;  %v3284_v1 = vld [vmem:[#allocation8 + $0x1d0] ss:$8 sps:$4 sm:$0xff]  }
 0x3a8   :  { %v2909_v5 = vpop.f32.mrf.mxu1 }
 0x3a9   :  { %v1255_v6 = vadd.bf16 %v3656_v0, %v1247_v4  ;;  %v3287_v4 = vld [vmem:[#allocation8 + $0x90] ss:$8 sps:$4 sm:$0xff]   ;;  %v3292_v5 = vld [vmem:[#allocation8 + $0x1c4] ss:$8 sps:$4 sm:$0xff]  }
 0x3ab   :  { %v1257_v7 = vmul.bf16 %v1255_v6, %v3658_v3  ;;  %vm1256_vm8 = vcmp.gt.bf16.partialorder %v1255_v6, 0 }
 0x3ad   :  { %v1258_v13 = vsel %vm1256_vm8, %v1255_v6, %v1257_v7  ;;  %v3295_v7 = vld [vmem:[#allocation8 + $0x84] ss:$8 sps:$4 sm:$0xff]  }
 0x3ae   :  { %2927 = vmatmul.mubr.bf16.vlgmr.msra.gmra.mxu0 %v1258_v13  ;;  %v3290_v13 = vld [vmem:[#allocation8 + $0x1c0] ss:$8 sps:$4 sm:$0xff]  }
 0x3af   :  { %1611 = vmatpush1.bf16.msra.mxu0 %v3175_v9  ;;  %1642 = vmatprep.mubr.bf16.mxu0 %v3491_v2  ;;  %v3206_v2 = vld [vmem:[#allocation6 + $0x28] ss:$16 sps:$4 sm:$0xff]  }
 0x3b0   :  { %1612 = vmatprep.subr.bf16.mxu0 %v3183_v12 }
 0x3b3   :  { %1613 = vmatpush1.bf16.msra.mxu0 %v3181_v14 }
 0x3b4   :  { %1614 = vmatprep.subr.bf16.mxu0 %v3189_v17 }
 0x3b7   :  { %1615 = vmatpush1.bf16.msra.mxu0 %v3187_v15  ;;  %v3293_v15 = vld [vmem:[#allocation8 + $0x80] ss:$8 sps:$4 sm:$0xff]  }
 0x3b8   :  { %1616 = vmatprep.subr.bf16.mxu0 %v3195_v16  ;;  %v3298_v16 = vld [vmem:[#allocation8 + $0x1b4] ss:$8 sps:$4 sm:$0xff]  }
 0x3bb   :  { %1617 = vmatpush1.bf16.msra.mxu0 %v3193_v18 }
 0x3bc   :  { %1618 = vmatprep.subr.bf16.mxu0 %v3201_v19  ;;  %v3296_v19 = vld [vmem:[#allocation8 + $0x1b0] ss:$8 sps:$4 sm:$0xff]  }
 0x3bf   :  { %1619 = vmatpush1.bf16.msra.mxu0 %v3199_v20 }
 0x3c0   :  { %1620 = vmatprep.subr.bf16.mxu0 %v3205_v21 }
 0x3c2   :  { %v1601_v61 = vpop.f32.mrf.mxu1 }
 0x3c3   :  { %1621 = vmatpush1.bf16.msra.mxu0 %v3203_v22  ;;  %v3301_v22 = vld [vmem:[#allocation8 + $0x1a4] ss:$8 sps:$4 sm:$0xff]  }
 0x3c4   :  { %1622 = vmatprep.subr.bf16.mxu0 %v3208_v23  ;;  %v1603_v63 = vpop.f32.mrf.mxu1  ;;  %v3299_v23 = vld [vmem:[#allocation8 + $0x1a0] ss:$8 sps:$4 sm:$0xff]  }
 0x3c6   :  { %v1605_v6 = vpop.f32.mrf.mxu1 }
 0x3c7   :  { %1623 = vmatpush1.bf16.msra.mxu0 %v3206_v2  ;;  %v1653_v9 = vpack.c.bf16 %v1605_v6, %v1601_v61  ;;  %v3304_v2 = vld [vmem:[#allocation8 + $0x194] ss:$8 sps:$4 sm:$0xff]  }
 0x3c8   :  { %1624 = vmatprep.subr.bf16.mxu0 %v3211_v24  ;;  %v1607_v12 = vpop.f32.mrf.mxu1  ;;  %v3302_v24 = vld [vmem:[#allocation8 + $0x190] ss:$8 sps:$4 sm:$0xff]  }
 0x3c9   :  { %v1661_v14 = vmul.bf16 %v1653_v9, %v3594_v43  ;;  %v1654_v17 = vpack.c.bf16 %v1607_v12, %v1603_v63  ;;  %vm1657_vm9 = vcmp.gt.bf16.partialorder %v1653_v9, 0  ;;  %v3325_v61 = vld [vmem:[#allocation11 + $0x30] sm:$0xff]   ;;  %v3327_v63 = vld [vmem:[#allocation11 + $0x20] sm:$0xff]  }
 0x3cb   :  { %1625 = vmatpush1.bf16.msra.mxu0 %v3209_v25  ;;  %v1662_v18 = vmul.bf16 %v1654_v17, %v3594_v43  ;;  %vm1658_vm10 = vcmp.gt.bf16.partialorder %v1654_v17, 0  ;;  %v1665_v21 = vsel %vm1657_vm9, %v1653_v9, %v1661_v14  ;;  %v3307_v25 = vld [vmem:[#allocation8 + $0x184] ss:$8 sps:$4 sm:$0xff]  }
 0x3cc   :  { %2096 = vmatprep.subr.bf16.mxu0 %v3226_v26  ;;  %v3305_v26 = vld [vmem:[#allocation8 + $0x180] ss:$8 sps:$4 sm:$0xff]  }
 0x3cd   :  { %v1666_v20 = vsel %vm1658_vm10, %v1654_v17, %v1662_v18 }
 0x3ce   :  { %1643 = vmatmul.mubr.bf16.vlgmr.msra.gmra.mxu0 %v3649_v36  ;;  %v3257_v36 = vld [vmem:[#allocation8 + $0xe0] ss:$8 sps:$4 sm:$0xff]   ;;  %2085 = vmatprep.mubr.bf16.mxu1 %v1666_v20 }
 0x3cf   :  { %2097 = vmatpush1.bf16.msra.mxu0 %v3224_v27  ;;  %2072 = vmatpush2.bf16.msra.mxu1 %v3257_v36  ;;  %v3308_v27 = vld [vmem:[#allocation9 + $0x78] sm:$0xff]  }
 0x3d0   :  { %2098 = vmatprep.subr.bf16.mxu0 %v3232_v28  ;;  %2073 = vmatprep.subr.bf16.mxu1 %v3265_v46  ;;  %v3309_v28 = vld [vmem:[#allocation9 + $0x38] sm:$0xff]  }
 0x3d3   :  { %2099 = vmatpush1.bf16.msra.mxu0 %v3230_v29  ;;  %2074 = vmatpush2.bf16.msra.mxu1 %v3263_v47  ;;  %v3310_v29 = vld [vmem:[#allocation9 + $0x70] sm:$0xff]  }
 0x3d4   :  { %2100 = vmatprep.subr.bf16.mxu0 %v3238_v30  ;;  %2075 = vmatprep.subr.bf16.mxu1 %v3271_v51  ;;  %v3311_v30 = vld [vmem:[#allocation9 + $0x30] sm:$0xff]  }
 0x3d7   :  { %2101 = vmatpush1.bf16.msra.mxu0 %v3236_v31  ;;  %2076 = vmatpush2.bf16.msra.mxu1 %v3269_v50  ;;  %v3312_v31 = vld [vmem:[#allocation9 + $0x68] sm:$0xff]  }
 0x3d8   :  { %2102 = vmatprep.subr.bf16.mxu0 %v3244_v32  ;;  %2077 = vmatprep.subr.bf16.mxu1 %v3277_v53  ;;  %v3313_v32 = vld [vmem:[#allocation9 + $0x28] sm:$0xff]   ;;  %v3316_v53 = vld [vmem:[#allocation9 + $0x58] sm:$0xff]  }
 0x3db   :  { %2103 = vmatpush1.bf16.msra.mxu0 %v3242_v33  ;;  %2078 = vmatpush2.bf16.msra.mxu1 %v3275_v55  ;;  %v3314_v33 = vld [vmem:[#allocation9 + $0x60] sm:$0xff]   ;;  %v3318_v55 = vld [vmem:[#allocation9 + $0x50] sm:$0xff]  }
 0x3dc   :  { %2104 = vmatprep.subr.bf16.mxu0 %v3250_v35  ;;  %2079 = vmatprep.subr.bf16.mxu1 %v3283_v57  ;;  %v3315_v35 = vld [vmem:[#allocation9 + $0x20] sm:$0xff]   ;;  %v3320_v57 = vld [vmem:[#allocation9 + $0x48] sm:$0xff]  }
 0x3df   :  { %2105 = vmatpush1.bf16.msra.mxu0 %v3248_v37  ;;  %2080 = vmatpush2.bf16.msra.mxu1 %v3281_v59  ;;  %v3323_v59 = vld [vmem:[#allocation9] sm:$0xff]  }
 0x3e0   :  { %2106 = vmatprep.subr.bf16.mxu0 %v3256_v38  ;;  %2081 = vmatprep.subr.bf16.mxu1 %v3289_v62  ;;  %v3326_v62 = vld [vmem:[#allocation11 + $0x28] sm:$0xff]  }
 0x3e3   :  { %2107 = vmatpush1.bf16.msra.mxu0 %v3254_v39  ;;  %2082 = vmatpush2.bf16.msra.mxu1 %v3287_v4 }
 0x3e4   :  { %2108 = vmatprep.subr.bf16.mxu0 %v3262_v44  ;;  %2083 = vmatprep.subr.bf16.mxu1 %v3295_v7 }
 0x3e7   :  { %2109 = vmatpush1.bf16.msra.mxu0 %v3260_v45  ;;  %2084 = vmatpush2.bf16.msra.mxu1 %v3293_v15 }
 0x3e8   :  { %2110 = vmatprep.subr.bf16.mxu0 %v3268_v49  ;;  %2850 = vmatprep.subr.bf16.mxu1 %v3308_v27  ;;  %v3333_v27 = vld [vmem:[#allocation12 + $0x30] sm:$0xff]  }
 0x3ea   :  { %2086 = vmatmul.mubr.bf16.vlgmr.msra.gmra.mxu1 %v1665_v21 }
 0x3eb   :  { %2111 = vmatpush1.bf16.msra.mxu0 %v3266_v48  ;;  %2851 = vmatpush3.bf16.msra.mxu1 %v3309_v28  ;;  %v3334_v28 = vld [vmem:[#allocation12 + $0x28] sm:$0xff]  }
 0x3ec   :  { %2112 = vmatprep.subr.bf16.mxu0 %v3274_v52  ;;  %2852 = vmatprep.subr.bf16.mxu1 %v3310_v29  ;;  %v3335_v29 = vld [vmem:[#allocation12 + $0x20] sm:$0xff]  }
 0x3ef   :  { %2113 = vmatpush2.bf16.msra.mxu0 %v3272_v54  ;;  %2853 = vmatpush3.bf16.msra.mxu1 %v3311_v30  ;;  %v3317_v54 = vld [vmem:[#allocation9 + $0x18] sm:$0xff]  }
 0x3f0   :  { %2114 = vmatprep.subr.bf16.mxu0 %v3280_v56  ;;  %2854 = vmatprep.subr.bf16.mxu1 %v3312_v31  ;;  %v3319_v56 = vld [vmem:[#allocation9 + $0x10] sm:$0xff]   ;;  %v3336_v30 = vld [vmem:[#allocation12 + $0x18] sm:$0xff]  }
 0x3f3   :  { %2115 = vmatpush2.bf16.msra.mxu0 %v3278_v58  ;;  %2855 = vmatpush3.bf16.msra.mxu1 %v3313_v32  ;;  %v3321_v58 = vld [vmem:[#allocation9 + $0x8] sm:$0xff]  }
 0x3f4   :  { %2116 = vmatprep.subr.bf16.mxu0 %v3286_v60  ;;  %2856 = vmatprep.subr.bf16.mxu1 %v3314_v33  ;;  %v3324_v60 = vld [vmem:[#allocation11 + $0x38] sm:$0xff]  }
 0x3f7   :  { %2117 = vmatpush2.bf16.msra.mxu0 %v3284_v1  ;;  %2857 = vmatpush3.bf16.msra.mxu1 %v3315_v35 }
 0x3f8   :  { %2118 = vmatprep.subr.bf16.mxu0 %v3292_v5  ;;  %2858 = vmatprep.subr.bf16.mxu1 %v3316_v53 }
 0x3fb   :  { %2119 = vmatpush2.bf16.msra.mxu0 %v3290_v13  ;;  %2859 = vmatpush3.bf16.msra.mxu1 %v3317_v54 }
 0x3fc   :  { %2120 = vmatprep.subr.bf16.mxu0 %v3298_v16  ;;  %2860 = vmatprep.subr.bf16.mxu1 %v3318_v55 }
 0x3ff   :  { %2121 = vmatpush2.bf16.msra.mxu0 %v3296_v19  ;;  %2861 = vmatpush3.bf16.msra.mxu1 %v3319_v56 }
 0x400   :  { %2122 = vmatprep.subr.bf16.mxu0 %v3301_v22  ;;  %2862 = vmatprep.subr.bf16.mxu1 %v3320_v57 }
 0x403   :  { %2123 = vmatpush2.bf16.msra.mxu0 %v3299_v23  ;;  %2863 = vmatpush3.bf16.msra.mxu1 %v3321_v58 }
 0x404   :  { %2124 = vmatprep.subr.bf16.mxu0 %v3304_v2 }
 0x407   :  { %2125 = vmatpush2.bf16.msra.mxu0 %v3302_v24 }
 0x408   :  { %2126 = vmatprep.subr.bf16.mxu0 %v3307_v25  ;;  %v3328_v25 = vld [vmem:[#allocation11 + $0x18] sm:$0xff]  }
 0x40b   :  { %2127 = vmatpush2.bf16.msra.mxu0 %v3305_v26  ;;  %v3332_v26 = vld [vmem:[#allocation12 + $0x38] sm:$0xff]  }
 0x40c   :  { %2930 = vmatprep.subr.bf16.mxu0 %v3492_v11 }
 0x46e   :  { %v1357_v37 = vpop.f32.mrf.mxu0 }
 0x46f   :  { %1365 = vst.msk [vmem:[%s3724_s12] sm:$0xff] %vm1364_vm11, %v1357_v37 }
 0x470   :  { %v2928_v38 = vpop.f32.mrf.mxu0 }
 0x472   :  { %v1360_v39 = vpop.f32.mrf.mxu0 }
 0x473   :  { %1366 = vst.msk [vmem:[%s3724_s12 + $0x8] sm:$0xff] %vm1364_vm11, %v1360_v39 }
 0x474   :  { %v2929_v40 = vpop.f32.mrf.mxu0 }
 0x48e   :  { %v1644_v36 = vpop.f32.mrf.mxu0 }
 0x490   :  { %v1646_v44 = vpop.f32.mrf.mxu0 }
 0x492   :  { %v1648_v45 = vpop.f32.mrf.mxu0 }
 0x493   :  { %v1655_v46 = vpack.c.bf16 %v1648_v45, %v1644_v36  ;;  %v3337_v45 = vld [vmem:[#allocation12 + $0x10] sm:$0xff]  }
 0x494   :  { %v1650_v47 = vpop.f32.mrf.mxu0 }
 0x495   :  { %v1656_v48 = vpack.c.bf16 %v1650_v47, %v1646_v44  ;;  %v1663_v49 = vmul.bf16 %v1655_v46, %v3594_v43  ;;  %vm1659_vm12 = vcmp.gt.bf16.partialorder %v1655_v46, 0  ;;  %v3339_v47 = vld [vmem:[#allocation12] sm:$0xff]  }
 0x497   :  { %v1664_v50 = vmul.bf16 %v1656_v48, %v3594_v43  ;;  %vm1660_vm13 = vcmp.gt.bf16.partialorder %v1656_v48, 0  ;;  %v1667_v52 = vsel %vm1659_vm12, %v1655_v46, %v1663_v49  ;;  %v3322_v43 = vld [vmem:[#allocation9 + $0x40] sm:$0xff]   ;;  %v3338_v46 = vld [vmem:[#allocation12 + $0x8] sm:$0xff]  }
 0x498   :  { %2864 = vmatprep.subr.bf16.mxu1 %v3322_v43 }
 0x499   :  { %v1668_v51 = vsel %vm1660_vm13, %v1656_v48, %v1664_v50  ;;  %2865 = vmatpush3.bf16.msra.mxu1 %v3323_v59 }
 0x49a   :  { %2128 = vmatprep.mubr.bf16.mxu0 %v1668_v51  ;;  %2950 = vmatprep.subr.bf16.mxu1 %v3492_v11 }
 0x49b   :  { %2129 = vmatmul.mubr.bf16.vlgmr.msra.gmra.mxu0 %v1667_v52 }
 0x49c   :  { %2946 = vmatprep.mubr.msk.bf16.mxu0 %vm3493_vm6, %v3492_v11  ;;  %2931 = vmatpush3.bf16.msra.mxu0 %v3324_v60 }
 0x49d   :  { %2932 = vmatprep.subr.bf16.mxu0 %v3492_v11 }
 0x4a0   :  { %2933 = vmatpush3.bf16.msra.mxu0 %v3325_v61 }
 0x4a1   :  { %2934 = vmatprep.subr.bf16.mxu0 %v3492_v11 }
 0x4a4   :  { %2935 = vmatpush3.bf16.msra.mxu0 %v3326_v62 }
 0x4a5   :  { %2936 = vmatprep.subr.bf16.mxu0 %v3492_v11 }
 0x4a8   :  { %2937 = vmatpush3.bf16.msra.mxu0 %v3327_v63 }
 0x4a9   :  { %2938 = vmatprep.subr.bf16.mxu0 %v3492_v11 }
 0x4aa   :  { %v2087_v1 = vpop.f32.mrf.mxu1 }
 0x4ac   :  { %v2089_v4 = vpop.f32.mrf.mxu1  ;;  %2939 = vmatpush3.bf16.msra.mxu0 %v3328_v25 }
 0x4ad   :  { %2940 = vmatprep.subr.bf16.mxu0 %v3492_v11 }
 0x4ae   :  { %v2091_v6 = vpop.f32.mrf.mxu1 }
 0x4b0   :  { %v2093_v14 = vpop.f32.mrf.mxu1 }
 0x55b   :  { %v2130_v5 = vpop.f32.mrf.mxu0 }
 0x55c   :  { %v2131_v12 = vadd.f32 %v2130_v5, %v2087_v1 }
 0x55d   :  { %v2132_v7 = vpop.f32.mrf.mxu0 }
 0x55e   :  { %v2133_v15 = vadd.f32 %v2132_v7, %v2089_v4 }
 0x55f   :  { %v2134_v9 = vpop.f32.mrf.mxu0 }
 0x560   :  { %v2135_v13 = vadd.f32 %v2134_v9, %v2091_v6 }
 0x561   :  { %v2136_v17 = vpop.f32.mrf.mxu0 }
 0x562   :  { %v2139_v16 = vpack.c.bf16 %v2135_v13, %v2131_v12  ;;  %v2137_v18 = vadd.f32 %v2136_v17, %v2093_v14 }
 0x564   :  { %v2141_v19 = vadd.bf16 %v2139_v16, %v3613_v34  ;;  %v2140_v20 = vpack.c.bf16 %v2137_v18, %v2133_v15  ;;  %v3329_v34 = vld [vmem:[#allocation11 + $0x10] sm:$0xff]  }
 0x565   :  { %2941 = vmatpush3.bf16.msra.mxu0 %v3329_v34 }
 0x566   :  { %v2142_v21 = vadd.bf16 %v2140_v20, %v3616_v41  ;;  %v2145_v22 = vmul.bf16 %v2141_v19, %v3618_v42  ;;  %vm2143_vm15 = vcmp.gt.bf16.partialorder %v2141_v19, 0  ;;  %2942 = vmatprep.subr.bf16.mxu0 %v3492_v11  ;;  %v3330_v41 = vld [vmem:[#allocation11 + $0x8] sm:$0xff]  }
 0x568   :  { %vm2144_vm14 = vcmp.gt.bf16.partialorder %v2142_v21, 0  ;;  %v2146_v23 = vmul.bf16 %v2142_v21, %v3618_v42  ;;  %v2147_v24 = vsel %vm2143_vm15, %v2141_v19, %v2145_v22  ;;  %v3331_v42 = vld [vmem:[#allocation11] sm:$0xff]  }
 0x569   :  { %2943 = vmatpush3.bf16.msra.mxu0 %v3330_v41 }
 0x56a   :  { %v2148_v2 = vsel %vm2144_vm14, %v2142_v21, %v2146_v23  ;;  %2944 = vmatprep.subr.bf16.mxu0 %v3492_v11 }
 0x56b   :  { %2309 = vmatprep.mubr.bf16.mxu1 %v2148_v2 }
 0x56c   :  { %2310 = vmatmul.mubr.bf16.vlgmr.msra.gmra.mxu1 %v2147_v24 }
 0x56d   :  { %2966 = vmatprep.mubr.msk.bf16.mxu1 %vm3493_vm6, %v3492_v11  ;;  %2945 = vmatpush3.bf16.msra.mxu0 %v3331_v42 }
 0x56e   :  { %2951 = vmatpush3.bf16.msra.mxu1 %v3332_v26 }
 0x56f   :  { %2952 = vmatprep.subr.bf16.mxu1 %v3492_v11 }
 0x572   :  { %2953 = vmatpush3.bf16.msra.mxu1 %v3333_v27 }
 0x573   :  { %2954 = vmatprep.subr.bf16.mxu1 %v3492_v11 }
 0x576   :  { %2955 = vmatpush3.bf16.msra.mxu1 %v3334_v28 }
 0x577   :  { %2956 = vmatprep.subr.bf16.mxu1 %v3492_v11 }
 0x57a   :  { %2957 = vmatpush3.bf16.msra.mxu1 %v3335_v29 }
 0x57b   :  { %2958 = vmatprep.subr.bf16.mxu1 %v3492_v11 }
 0x57e   :  { %2959 = vmatpush3.bf16.msra.mxu1 %v3336_v30 }
 0x57f   :  { %2960 = vmatprep.subr.bf16.mxu1 %v3492_v11 }
 0x582   :  { %2961 = vmatpush3.bf16.msra.mxu1 %v3337_v45 }
 0x583   :  { %2962 = vmatprep.subr.bf16.mxu1 %v3492_v11 }
 0x586   :  { %2963 = vmatpush3.bf16.msra.mxu1 %v3338_v46 }
 0x587   :  { %2964 = vmatprep.subr.bf16.mxu1 %v3492_v11 }
 0x58a   :  { %2965 = vmatpush3.bf16.msra.mxu1 %v3339_v47 }
 0x62c   :  { %v2866_v31 = vpop.f32.mrf.mxu1 }
 0x62e   :  { %v2867_v32 = vpop.f32.mrf.mxu1 }
 0x62f   :  { %v2868_v37 = vadd.f32 %v2867_v32, %v2866_v31 }
 0x630   :  { %v2869_v33 = vpop.f32.mrf.mxu1 }
 0x632   :  { %v2870_v35 = vpop.f32.mrf.mxu1 }
 0x633   :  { %v2871_v38 = vadd.f32 %v2870_v35, %v2869_v33 }
 0x635   :  { %v2318_v39 = vpack.c.bf16 %v2871_v38, %v2868_v37 }
 0x637   :  { %v2319_v40 = vadd.bf16 %v2318_v39, %v3640_v8 }
 0x639   :  { %vm2320_vm0 = vcmp.gt.bf16.partialorder %v2319_v40, 0  ;;  %v2321_v36 = vmul.bf16 %v2319_v40, %v3642_v10 }
 0x63b   :  { %v2322_v44 = vsel %vm2320_vm0, %v2319_v40, %v2321_v36 }
 0x63c   :  { %2947 = vmatmul.mubr.bf16.vlgmr.msra.gmra.mxu0 %v2322_v44 }
 0x6fc   :  { %v2421_v48 = vpop.f32.mrf.mxu0 }
 0x6fe   :  { %v2948_v49 = vpop.f32.mrf.mxu0 }
 0x700   :  { %v2424_v50 = vpop.f32.mrf.mxu0 }
 0x701   :  { %v2428_v51 = vpack.c.bf16 %v2424_v50, %v2421_v48 }
 0x702   :  { %v2949_v8 = vpop.f32.mrf.mxu0 }
 0x703   :  { %v2429_v52 = vadd.bf16 %v2428_v51, %v3656_v0 }
 0x705   :  { %v2431_v10 = vmul.bf16 %v2429_v52, %v3658_v3  ;;  %vm2430_vm1 = vcmp.gt.bf16.partialorder %v2429_v52, 0 }
 0x707   :  { %v2432_v53 = vsel %vm2430_vm1, %v2429_v52, %v2431_v10 }
 0x708   :  { %2967 = vmatmul.mubr.bf16.vlgmr.msra.gmra.mxu1 %v2432_v53 }
 0x7c8   :  { %v2531_v54 = vpop.f32.mrf.mxu1 }
 0x7c9   :  { %2538 = vst.msk [vmem:[%s3724_s12 + $0x10] sm:$0xff] %vm1364_vm11, %v2531_v54 }
 0x7ca   :  { %v2968_v11 = vpop.f32.mrf.mxu1 }
 0x7cc   :  { %v2534_v55 = vpop.f32.mrf.mxu1 }
 0x7cd   :  { %2539 = vst.msk [vmem:[%s3724_s12 + $0x18] sm:$0xff] %vm1364_vm11, %v2534_v55 }
 0x7ce   :  { %v2969_v56 = vpop.f32.mrf.mxu1 }
 0x7cf   :  { %2544 = vsyncpa [#allocation3], 1 }
 0x7d0   :  { %2545 = vsyncpa [#allocation7], 1 }
 0x7d1   :  { %2546 = vsyncpa [#allocation10], 1 }
 0x7d2   :  { %2547 = vsyncpa [#allocation13], 1 }
 0x7d3   :  { %2548 = vsyncpa [#allocation4], 1 }

</bundles_post_ra>
